<compile_context>
chip_gen: v6e
topology: v6e:2x2x1
jax: 0.10.0
libtpu: 0.0.40
codegen_flags: <defaults>
</compile_context>

<pallas_src>
import jax
import jax.numpy as jnp
from jax.experimental import pallas as pl
from jax.experimental.pallas import tpu as pltpu

# Module-fixed shapes (input torch.Size([1, 832, 7, 7])).
N, CIN, H, W = 1, 832, 7, 7
HW = H * W                      # 49
CINP = 896                      # CIN zero-padded to 7*128 (dense K for the 1x1 matmul)
C1, C1P = 48, 128               # true / lane-padded intermediate channels
C2 = 128
PAD = W + 1                     # max |flattened tap offset| = 8 -> zero-halo rows
EPS = 1e-3


def fused_block_kernel(x_ref, w1_ref, b1_ref, w2_ref, b2_ref, o_ref,
                       mid_ref, patch_ref):
    """One grid step = one batch element; all data in flattened (H*W, C) form.

    x_ref    : (HW, CINP)       bf16  input (NHWC flattened; padded channels = 0)
    w1_ref   : (CINP, C1P)      bf16  1x1 conv weight, BN1 scale folded, zero-padded
    b1_ref   : (1, C1P)         f32   folded BN1 bias (0 in padded channels)
    w2_ref   : (9*C1P, C2)      bf16  3x3 conv weight, tap-major im2col layout,
                                      BN2 scale folded, zero rows for padded channels
    b2_ref   : (1, C2)          f32   folded BN2 bias
    o_ref    : (HW, C2)         f32   output
    mid_ref  : (2*PAD+HW, C1P)  f32   scratch: intermediate with zero halo rows
    patch_ref: (HW, 9*C1P)      bf16  scratch: im2col patches
    """
    # Only the halo rows need zeros (the interior is fully rewritten each step).
    mid_ref[0:PAD, :] = jnp.zeros((PAD, C1P), jnp.float32)
    mid_ref[PAD + HW:2 * PAD + HW, :] = jnp.zeros((PAD, C1P), jnp.float32)

    # ---- 1x1 conv (channel matmul) + folded-BN bias + ReLU -------------------
    mid = jnp.dot(x_ref[...], w1_ref[...], preferred_element_type=jnp.float32)
    mid = jnp.maximum(mid + b1_ref[...], 0.0)
    mid_ref[PAD:PAD + HW, :] = mid

    # ---- im2col in the flattened row domain ----------------------------------
    # Output row r = y*W + x reads input row r + off with off = (dy-1)*W + (dx-1).
    # Rows that fall off the top/bottom hit the zero halo; rows whose x coordinate
    # wraps are masked with a per-row predicate (lane-broadcast).
    col = jax.lax.broadcasted_iota(jnp.int32, (HW, 1), 0) % W   # x coord of each row
    for t in range(9):
        dy, dx = t // 3, t % 3
        off = (dy - 1) * W + (dx - 1)
        tap = mid_ref[PAD + off:PAD + off + HW, :]
        if dx == 0:
            tap = jnp.where(col >= 1, tap, jnp.zeros_like(tap))
        elif dx == 2:
            tap = jnp.where(col <= W - 2, tap, jnp.zeros_like(tap))
        patch_ref[:, t * C1P:(t + 1) * C1P] = tap.astype(patch_ref.dtype)

    # ---- 3x3 conv as ONE im2col matmul + folded-BN bias + ReLU ----------------
    out = jnp.dot(patch_ref[...], w2_ref[...], preferred_element_type=jnp.float32)
    o_ref[...] = jnp.maximum(out + b2_ref[...], 0.0)


def fused_block(x2d, w1, b1, w2, b2):
    n = x2d.shape[0]
    return pl.pallas_call(
        fused_block_kernel,
        out_shape=jax.ShapeDtypeStruct((n, HW, C2), jnp.float32),
        grid_spec=pltpu.PrefetchScalarGridSpec(
            num_scalar_prefetch=0,
            grid=(n,),
            in_specs=[
                pl.BlockSpec((None, HW, CINP), lambda b: (b, 0, 0)),
                pl.BlockSpec((CINP, C1P), lambda b: (0, 0)),
                pl.BlockSpec((1, C1P), lambda b: (0, 0)),
                pl.BlockSpec((9 * C1P, C2), lambda b: (0, 0)),
                pl.BlockSpec((1, C2), lambda b: (0, 0)),
            ],
            out_specs=pl.BlockSpec((None, HW, C2), lambda b: (b, 0, 0)),
            scratch_shapes=[
                pltpu.VMEM((2 * PAD + HW, C1P), jnp.float32),
                pltpu.VMEM((HW, 9 * C1P), jnp.bfloat16),
            ],
        ),
        compiler_params=pltpu.CompilerParams(
            # N=1 today; a real batch dimension shards across v7x's 2 TCs for free.
            dimension_semantics=("parallel",)),
    )(x2d, w1, b1, w2, b2)


def make_params(key):
    """Random module parameters (PyTorch layout) + kernel-packed versions."""
    ks = jax.random.split(key, 10)
    w1_oihw = jax.random.normal(ks[0], (C1, CIN, 1, 1), jnp.float32) * 0.02
    w2_oihw = jax.random.normal(ks[1], (C2, C1, 3, 3), jnp.float32) * 0.05
    g1 = 1.0 + 0.1 * jax.random.normal(ks[2], (C1,), jnp.float32)
    be1 = 0.1 * jax.random.normal(ks[3], (C1,), jnp.float32)
    m1 = 0.1 * jax.random.normal(ks[4], (C1,), jnp.float32)
    v1 = jax.random.uniform(ks[5], (C1,), jnp.float32, 0.5, 1.5)
    g2 = 1.0 + 0.1 * jax.random.normal(ks[6], (C2,), jnp.float32)
    be2 = 0.1 * jax.random.normal(ks[7], (C2,), jnp.float32)
    m2 = 0.1 * jax.random.normal(ks[8], (C2,), jnp.float32)
    v2 = jax.random.uniform(ks[9], (C2,), jnp.float32, 0.5, 1.5)
    raw = (w1_oihw, g1, be1, m1, v1, w2_oihw, g2, be2, m2, v2)

    # Fold BN (eval form) into the conv weights; only a bias remains in-kernel.
    s1 = g1 / jnp.sqrt(v1 + EPS)
    s2 = g2 / jnp.sqrt(v2 + EPS)

    w1 = jnp.zeros((CINP, C1P), jnp.float32)
    w1 = w1.at[:CIN, :C1].set(w1_oihw[:, :, 0, 0].T * s1[None, :]).astype(jnp.bfloat16)
    b1 = jnp.zeros((1, C1P), jnp.float32).at[0, :C1].set(be1 - m1 * s1)

    w2_hwio = jnp.transpose(w2_oihw * s2[:, None, None, None], (2, 3, 1, 0))  # (3,3,C1,C2)
    w2 = jnp.zeros((3, 3, C1P, C2), jnp.float32)
    w2 = w2.at[:, :, :C1, :].set(w2_hwio).reshape(9 * C1P, C2).astype(jnp.bfloat16)
    b2 = (be2 - m2 * s2)[None, :].astype(jnp.float32)

    return (w1, b1, w2, b2), raw


def forward(x_nchw, params):
    """NCHW f32 in -> NCHW f32 out, matching the PyTorch module."""
    w1, b1, w2, b2 = params
    n = x_nchw.shape[0]
    # NOTE: these transposes are plain XLA ops outside the kernel; in a real model
    # keep activations in NHWC / (N, H*W, C) end-to-end to avoid them.
    x2d = jnp.transpose(x_nchw, (0, 2, 3, 1)).reshape(n, HW, CIN)
    x2d = jnp.pad(x2d, ((0, 0), (0, 0), (0, CINP - CIN))).astype(jnp.bfloat16)
    y2d = fused_block(x2d, w1, b1, w2, b2)                        # (n, HW, C2) f32
    return jnp.transpose(y2d.reshape(n, H, W, C2), (0, 3, 1, 2))


def reference_matched(x_nchw, params):
    """Plain-JAX reference using the exact bf16-rounded folded weights the kernel
    consumes (isolates kernel-logic errors from bf16 quantization)."""
    w1, b1, w2, b2 = params
    hp = jax.lax.Precision.HIGHEST
    x = jnp.transpose(x_nchw, (0, 2, 3, 1)).astype(jnp.bfloat16).astype(jnp.float32)
    w1f = w1.astype(jnp.float32)[:CIN, :C1]                       # (CIN, C1)
    y = jnp.einsum('nhwc,cd->nhwd', x, w1f, precision=hp) + b1[0, :C1]
    y = jnp.maximum(y, 0.0).astype(jnp.bfloat16).astype(jnp.float32)
    w2f = w2.astype(jnp.float32).reshape(3, 3, C1P, C2)[:, :, :C1, :]   # HWIO
    dn = jax.lax.conv_dimension_numbers(y.shape, w2f.shape, ('NHWC', 'HWIO', 'NHWC'))
    z = jax.lax.conv_general_dilated(y, w2f, (1, 1), ((1, 1), (1, 1)),
                                     dimension_numbers=dn, precision=hp)
    z = jnp.maximum(z + b2[0], 0.0)
    return jnp.transpose(z, (0, 3, 1, 2))


def reference_f32(x_nchw, raw):
    """Full-precision f32 reference of the original module (eval-mode BN)."""
    (w1_oihw, g1, be1, m1, v1, w2_oihw, g2, be2, m2, v2) = raw
    hp = jax.lax.Precision.HIGHEST
    s1 = g1 / jnp.sqrt(v1 + EPS); t1 = be1 - m1 * s1
    s2 = g2 / jnp.sqrt(v2 + EPS); t2 = be2 - m2 * s2
    dn1 = jax.lax.conv_dimension_numbers(x_nchw.shape, w1_oihw.shape,
                                         ('NCHW', 'OIHW', 'NCHW'))
    y = jax.lax.conv_general_dilated(x_nchw, w1_oihw, (1, 1), 'VALID',
                                     dimension_numbers=dn1, precision=hp)
    y = jnp.maximum(y * s1[None, :, None, None] + t1[None, :, None, None], 0.0)
    dn2 = jax.lax.conv_dimension_numbers(y.shape, w2_oihw.shape,
                                         ('NCHW', 'OIHW', 'NCHW'))
    z = jax.lax.conv_general_dilated(y, w2_oihw, (1, 1), ((1, 1), (1, 1)),
                                     dimension_numbers=dn2, precision=hp)
    return jnp.maximum(z * s2[None, :, None, None] + t2[None, :, None, None], 0.0)


if __name__ == "__main__":
    key = jax.random.PRNGKey(0)
    kx, kp = jax.random.split(key)
    x = jax.random.normal(kx, (N, CIN, H, W), jnp.float32)   # matches torch input [1,832,7,7]
    params, raw = make_params(kp)

    out = jax.block_until_ready(forward(x, params))
    ref_b = jax.block_until_ready(reference_matched(x, params))
    ref_f = jax.block_until_ready(reference_f32(x, raw))

    assert out.shape == (N, C2, H, W), out.shape
    # Same bf16-rounded weights/activations -> should agree tightly.
    assert jnp.allclose(out, ref_b, rtol=2e-3, atol=2e-3), \
        float(jnp.max(jnp.abs(out - ref_b)))
    # Against pure-f32 module semantics expect only bf16-level deviation.
    assert jnp.allclose(out, ref_f, rtol=3e-2, atol=3e-2), \
        float(jnp.max(jnp.abs(out - ref_f)))
    print("KERNEL_OK")
</pallas_src>

<mosaic_0001>
module attributes {stable_mosaic.version = 11 : i64} {
  func.func @fused_block_kernel(%arg0: i32, %arg1: memref<1x49x896xbf16, #tpu.memory_space<vmem>>, %arg2: memref<896x128xbf16, #tpu.memory_space<vmem>>, %arg3: memref<1x128xf32, #tpu.memory_space<vmem>>, %arg4: memref<1152x128xbf16, #tpu.memory_space<vmem>>, %arg5: memref<1x128xf32, #tpu.memory_space<vmem>>, %arg6: memref<1x49x128xf32, #tpu.memory_space<vmem>>, %arg7: memref<65x128xf32, #tpu.memory_space<vmem>>, %arg8: memref<49x1152xbf16, #tpu.memory_space<vmem>>) attributes {dimension_semantics = [#tpu.dimension_semantics<parallel>], iteration_bounds = array<i64: 1>, scalar_prefetch = 0 : i64, scratch_operands = 2 : i64, tpu.core_type = #tpu.core_type<tc>, window_params = [{transform_indices = @transform_0, window_bounds = array<i64: 1, 49, 896>}, {pipeline_mode = #tpu.pipeline_mode<synchronous>, transform_indices = @transform_1, window_bounds = array<i64: 896, 128>}, {pipeline_mode = #tpu.pipeline_mode<synchronous>, transform_indices = @transform_2, window_bounds = array<i64: 1, 128>}, {pipeline_mode = #tpu.pipeline_mode<synchronous>, transform_indices = @transform_3, window_bounds = array<i64: 1152, 128>}, {pipeline_mode = #tpu.pipeline_mode<synchronous>, transform_indices = @transform_4, window_bounds = array<i64: 1, 128>}, {transform_indices = @transform_5, window_bounds = array<i64: 1, 49, 128>}]} {
    %cst = arith.constant 0.000000e+00 : f32
    %0 = vector.broadcast %cst : f32 to vector<8x128xf32>
    %c0 = arith.constant 0 : index
    %c0_0 = arith.constant 0 : index
    %1 = vector.load %arg7[%c0, %c0_0] : memref<65x128xf32, #tpu.memory_space<vmem>>, vector<8x128xf32>
    tpu.vector_store %arg7[%c0, %c0_0], %0 {strides = array<i32>} : memref<65x128xf32, #tpu.memory_space<vmem>>, vector<8x128xf32>,
    %cst_1 = arith.constant 0.000000e+00 : f32
    %2 = vector.broadcast %cst_1 : f32 to vector<8x128xf32>
    %c57 = arith.constant 57 : index
    %c0_2 = arith.constant 0 : index
    %3 = vector.load %arg7[%c57, %c0_2] : memref<65x128xf32, #tpu.memory_space<vmem>>, vector<8x128xf32>
    tpu.vector_store %arg7[%c57, %c0_2], %2 {strides = array<i32>} : memref<65x128xf32, #tpu.memory_space<vmem>>, vector<8x128xf32>,
    %c0_3 = arith.constant 0 : index
    %c0_4 = arith.constant 0 : index
    %c0_5 = arith.constant 0 : index
    %4 = vector.load %arg1[%c0_3, %c0_4, %c0_5] : memref<1x49x896xbf16, #tpu.memory_space<vmem>>, vector<1x49x896xbf16>
    %5 = vector.shape_cast %4 : vector<1x49x896xbf16> to vector<49x896xbf16>
    %c0_6 = arith.constant 0 : index
    %c0_7 = arith.constant 0 : index
    %6 = vector.load %arg2[%c0_6, %c0_7] : memref<896x128xbf16, #tpu.memory_space<vmem>>, vector<896x128xbf16>
    %cst_8 = arith.constant dense<0.000000e+00> : vector<49x128xf32>
    %7 = tpu.matmul %5, %6, %cst_8 {dimension_numbers = #tpu.dot_dimension_numbers<[1], [0], [0], [1], [0, 0, 1, 1], [], []>} : vector<49x896xbf16>, vector<896x128xbf16>, vector<49x128xf32> -> vector<49x128xf32>
    %c0_9 = arith.constant 0 : index
    %c0_10 = arith.constant 0 : index
    %8 = vector.load %arg3[%c0_9, %c0_10] : memref<1x128xf32, #tpu.memory_space<vmem>>, vector<1x128xf32>
    %9 = vector.broadcast %8 : vector<1x128xf32> to vector<49x128xf32>
    %10 = arith.addf %7, %9 : vector<49x128xf32>
    %cst_11 = arith.constant 0.000000e+00 : f32
    %11 = vector.broadcast %cst_11 : f32 to vector<49x128xf32>
    %12 = arith.maximumf %10, %11 : vector<49x128xf32>
    %c8 = arith.constant 8 : index
    %c0_12 = arith.constant 0 : index
    %13 = vector.load %arg7[%c8, %c0_12] : memref<65x128xf32, #tpu.memory_space<vmem>>, vector<49x128xf32>
    tpu.vector_store %arg7[%c8, %c0_12], %12 {strides = array<i32>} : memref<65x128xf32, #tpu.memory_space<vmem>>, vector<49x128xf32>,
    %14 = tpu.iota {dimensions = array<i32: 0>} : vector<49x1xi32>
    %c7_i32 = arith.constant 7 : i32
    %c0_i32 = arith.constant 0 : i32
    %15 = arith.cmpi eq, %c7_i32, %c0_i32 : i32
    %c1_i32 = arith.constant 1 : i32
    %16 = arith.select %15, %c1_i32, %c7_i32 : i32
    %17 = vector.broadcast %16 : i32 to vector<49x1xi32>
    %18 = arith.remsi %14, %17 : vector<49x1xi32>
    %c0_i32_13 = arith.constant 0 : i32
    %19 = vector.broadcast %c0_i32_13 : i32 to vector<49x1xi32>
    %20 = arith.cmpi ne, %18, %19 : vector<49x1xi32>
    %c0_i32_14 = arith.constant 0 : i32
    %21 = vector.broadcast %c0_i32_14 : i32 to vector<49x1xi32>
    %22 = arith.cmpi slt, %18, %21 : vector<49x1xi32>
    %c0_i32_15 = arith.constant 0 : i32
    %23 = arith.cmpi slt, %16, %c0_i32_15 : i32
    %24 = vector.broadcast %23 : i1 to vector<49x1xi1>
    %25 = vector.broadcast %24 : vector<49x1xi1> to vector<49x1xi1>
    %26 = arith.xori %22, %25 : vector<49x1xi1>
    %27 = arith.andi %26, %20 : vector<49x1xi1>
    %28 = vector.broadcast %16 : i32 to vector<49x1xi32>
    %29 = arith.addi %18, %28 : vector<49x1xi32>
    %30 = arith.select %27, %29, %18 : vector<49x1xi1>, vector<49x1xi32>
    %c0_16 = arith.constant 0 : index
    %c0_17 = arith.constant 0 : index
    %31 = vector.load %arg7[%c0_16, %c0_17] : memref<65x128xf32, #tpu.memory_space<vmem>>, vector<49x128xf32>
    %c1_i32_18 = arith.constant 1 : i32
    %32 = vector.broadcast %c1_i32_18 : i32 to vector<49x1xi32>
    %33 = arith.cmpi sge, %30, %32 : vector<49x1xi32>
    %cst_19 = arith.constant 0.000000e+00 : f32
    %34 = vector.broadcast %cst_19 : f32 to vector<49x128xf32>
    %35 = vector.shape_cast %33 : vector<49x1xi1> to vector<49x1xi1>
    %36 = vector.broadcast %35 : vector<49x1xi1> to vector<49x128xi1>
    %37 = arith.select %36, %31, %34 : vector<49x128xi1>, vector<49x128xf32>
    %38 = arith.truncf %37 : vector<49x128xf32> to vector<49x128xbf16>
    %c0_20 = arith.constant 0 : index
    %c0_21 = arith.constant 0 : index
    %39 = vector.load %arg8[%c0_20, %c0_21] : memref<49x1152xbf16, #tpu.memory_space<vmem>>, vector<49x128xbf16>
    tpu.vector_store %arg8[%c0_20, %c0_21], %38 {strides = array<i32>} : memref<49x1152xbf16, #tpu.memory_space<vmem>>, vector<49x128xbf16>,
    %c1 = arith.constant 1 : index
    %c0_22 = arith.constant 0 : index
    %40 = vector.load %arg7[%c1, %c0_22] : memref<65x128xf32, #tpu.memory_space<vmem>>, vector<49x128xf32>
    %41 = arith.truncf %40 : vector<49x128xf32> to vector<49x128xbf16>
    %c0_23 = arith.constant 0 : index
    %c128 = arith.constant 128 : index
    %42 = vector.load %arg8[%c0_23, %c128] : memref<49x1152xbf16, #tpu.memory_space<vmem>>, vector<49x128xbf16>
    tpu.vector_store %arg8[%c0_23, %c128], %41 {strides = array<i32>} : memref<49x1152xbf16, #tpu.memory_space<vmem>>, vector<49x128xbf16>,
    %c2 = arith.constant 2 : index
    %c0_24 = arith.constant 0 : index
    %43 = vector.load %arg7[%c2, %c0_24] : memref<65x128xf32, #tpu.memory_space<vmem>>, vector<49x128xf32>
    %c5_i32 = arith.constant 5 : i32
    %44 = vector.broadcast %c5_i32 : i32 to vector<49x1xi32>
    %45 = arith.cmpi sle, %30, %44 : vector<49x1xi32>
    %cst_25 = arith.constant 0.000000e+00 : f32
    %46 = vector.broadcast %cst_25 : f32 to vector<49x128xf32>
    %47 = vector.shape_cast %45 : vector<49x1xi1> to vector<49x1xi1>
    %48 = vector.broadcast %47 : vector<49x1xi1> to vector<49x128xi1>
    %49 = arith.select %48, %43, %46 : vector<49x128xi1>, vector<49x128xf32>
    %50 = arith.truncf %49 : vector<49x128xf32> to vector<49x128xbf16>
    %c0_26 = arith.constant 0 : index
    %c256 = arith.constant 256 : index
    %51 = vector.load %arg8[%c0_26, %c256] : memref<49x1152xbf16, #tpu.memory_space<vmem>>, vector<49x128xbf16>
    tpu.vector_store %arg8[%c0_26, %c256], %50 {strides = array<i32>} : memref<49x1152xbf16, #tpu.memory_space<vmem>>, vector<49x128xbf16>,
    %c7 = arith.constant 7 : index
    %c0_27 = arith.constant 0 : index
    %52 = vector.load %arg7[%c7, %c0_27] : memref<65x128xf32, #tpu.memory_space<vmem>>, vector<49x128xf32>
    %c1_i32_28 = arith.constant 1 : i32
    %53 = vector.broadcast %c1_i32_28 : i32 to vector<49x1xi32>
    %54 = arith.cmpi sge, %30, %53 : vector<49x1xi32>
    %cst_29 = arith.constant 0.000000e+00 : f32
    %55 = vector.broadcast %cst_29 : f32 to vector<49x128xf32>
    %56 = vector.shape_cast %54 : vector<49x1xi1> to vector<49x1xi1>
    %57 = vector.broadcast %56 : vector<49x1xi1> to vector<49x128xi1>
    %58 = arith.select %57, %52, %55 : vector<49x128xi1>, vector<49x128xf32>
    %59 = arith.truncf %58 : vector<49x128xf32> to vector<49x128xbf16>
    %c0_30 = arith.constant 0 : index
    %c384 = arith.constant 384 : index
    %60 = vector.load %arg8[%c0_30, %c384] : memref<49x1152xbf16, #tpu.memory_space<vmem>>, vector<49x128xbf16>
    tpu.vector_store %arg8[%c0_30, %c384], %59 {strides = array<i32>} : memref<49x1152xbf16, #tpu.memory_space<vmem>>, vector<49x128xbf16>,
    %c8_31 = arith.constant 8 : index
    %c0_32 = arith.constant 0 : index
    %61 = vector.load %arg7[%c8_31, %c0_32] : memref<65x128xf32, #tpu.memory_space<vmem>>, vector<49x128xf32>
    %62 = arith.truncf %61 : vector<49x128xf32> to vector<49x128xbf16>
    %c0_33 = arith.constant 0 : index
    %c512 = arith.constant 512 : index
    %63 = vector.load %arg8[%c0_33, %c512] : memref<49x1152xbf16, #tpu.memory_space<vmem>>, vector<49x128xbf16>
    tpu.vector_store %arg8[%c0_33, %c512], %62 {strides = array<i32>} : memref<49x1152xbf16, #tpu.memory_space<vmem>>, vector<49x128xbf16>,
    %c9 = arith.constant 9 : index
    %c0_34 = arith.constant 0 : index
    %64 = vector.load %arg7[%c9, %c0_34] : memref<65x128xf32, #tpu.memory_space<vmem>>, vector<49x128xf32>
    %c5_i32_35 = arith.constant 5 : i32
    %65 = vector.broadcast %c5_i32_35 : i32 to vector<49x1xi32>
    %66 = arith.cmpi sle, %30, %65 : vector<49x1xi32>
    %cst_36 = arith.constant 0.000000e+00 : f32
    %67 = vector.broadcast %cst_36 : f32 to vector<49x128xf32>
    %68 = vector.shape_cast %66 : vector<49x1xi1> to vector<49x1xi1>
    %69 = vector.broadcast %68 : vector<49x1xi1> to vector<49x128xi1>
    %70 = arith.select %69, %64, %67 : vector<49x128xi1>, vector<49x128xf32>
    %71 = arith.truncf %70 : vector<49x128xf32> to vector<49x128xbf16>
    %c0_37 = arith.constant 0 : index
    %c640 = arith.constant 640 : index
    %72 = vector.load %arg8[%c0_37, %c640] : memref<49x1152xbf16, #tpu.memory_space<vmem>>, vector<49x128xbf16>
    tpu.vector_store %arg8[%c0_37, %c640], %71 {strides = array<i32>} : memref<49x1152xbf16, #tpu.memory_space<vmem>>, vector<49x128xbf16>,
    %c14 = arith.constant 14 : index
    %c0_38 = arith.constant 0 : index
    %73 = vector.load %arg7[%c14, %c0_38] : memref<65x128xf32, #tpu.memory_space<vmem>>, vector<49x128xf32>
    %c1_i32_39 = arith.constant 1 : i32
    %74 = vector.broadcast %c1_i32_39 : i32 to vector<49x1xi32>
    %75 = arith.cmpi sge, %30, %74 : vector<49x1xi32>
    %cst_40 = arith.constant 0.000000e+00 : f32
    %76 = vector.broadcast %cst_40 : f32 to vector<49x128xf32>
    %77 = vector.shape_cast %75 : vector<49x1xi1> to vector<49x1xi1>
    %78 = vector.broadcast %77 : vector<49x1xi1> to vector<49x128xi1>
    %79 = arith.select %78, %73, %76 : vector<49x128xi1>, vector<49x128xf32>
    %80 = arith.truncf %79 : vector<49x128xf32> to vector<49x128xbf16>
    %c0_41 = arith.constant 0 : index
    %c768 = arith.constant 768 : index
    %81 = vector.load %arg8[%c0_41, %c768] : memref<49x1152xbf16, #tpu.memory_space<vmem>>, vector<49x128xbf16>
    tpu.vector_store %arg8[%c0_41, %c768], %80 {strides = array<i32>} : memref<49x1152xbf16, #tpu.memory_space<vmem>>, vector<49x128xbf16>,
    %c15 = arith.constant 15 : index
    %c0_42 = arith.constant 0 : index
    %82 = vector.load %arg7[%c15, %c0_42] : memref<65x128xf32, #tpu.memory_space<vmem>>, vector<49x128xf32>
    %83 = arith.truncf %82 : vector<49x128xf32> to vector<49x128xbf16>
    %c0_43 = arith.constant 0 : index
    %c896 = arith.constant 896 : index
    %84 = vector.load %arg8[%c0_43, %c896] : memref<49x1152xbf16, #tpu.memory_space<vmem>>, vector<49x128xbf16>
    tpu.vector_store %arg8[%c0_43, %c896], %83 {strides = array<i32>} : memref<49x1152xbf16, #tpu.memory_space<vmem>>, vector<49x128xbf16>,
    %c16 = arith.constant 16 : index
    %c0_44 = arith.constant 0 : index
    %85 = vector.load %arg7[%c16, %c0_44] : memref<65x128xf32, #tpu.memory_space<vmem>>, vector<49x128xf32>
    %c5_i32_45 = arith.constant 5 : i32
    %86 = vector.broadcast %c5_i32_45 : i32 to vector<49x1xi32>
    %87 = arith.cmpi sle, %30, %86 : vector<49x1xi32>
    %cst_46 = arith.constant 0.000000e+00 : f32
    %88 = vector.broadcast %cst_46 : f32 to vector<49x128xf32>
    %89 = vector.shape_cast %87 : vector<49x1xi1> to vector<49x1xi1>
    %90 = vector.broadcast %89 : vector<49x1xi1> to vector<49x128xi1>
    %91 = arith.select %90, %85, %88 : vector<49x128xi1>, vector<49x128xf32>
    %92 = arith.truncf %91 : vector<49x128xf32> to vector<49x128xbf16>
    %c0_47 = arith.constant 0 : index
    %c1024 = arith.constant 1024 : index
    %93 = vector.load %arg8[%c0_47, %c1024] : memref<49x1152xbf16, #tpu.memory_space<vmem>>, vector<49x128xbf16>
    tpu.vector_store %arg8[%c0_47, %c1024], %92 {strides = array<i32>} : memref<49x1152xbf16, #tpu.memory_space<vmem>>, vector<49x128xbf16>,
    %c0_48 = arith.constant 0 : index
    %c0_49 = arith.constant 0 : index
    %94 = vector.load %arg8[%c0_48, %c0_49] : memref<49x1152xbf16, #tpu.memory_space<vmem>>, vector<49x1152xbf16>
    %c0_50 = arith.constant 0 : index
    %c0_51 = arith.constant 0 : index
    %95 = vector.load %arg4[%c0_50, %c0_51] : memref<1152x128xbf16, #tpu.memory_space<vmem>>, vector<1152x128xbf16>
    %cst_52 = arith.constant dense<0.000000e+00> : vector<49x128xf32>
    %96 = tpu.matmul %94, %95, %cst_52 {dimension_numbers = #tpu.dot_dimension_numbers<[1], [0], [0], [1], [0, 0, 1, 1], [], []>} : vector<49x1152xbf16>, vector<1152x128xbf16>, vector<49x128xf32> -> vector<49x128xf32>
    %c0_53 = arith.constant 0 : index
    %c0_54 = arith.constant 0 : index
    %97 = vector.load %arg5[%c0_53, %c0_54] : memref<1x128xf32, #tpu.memory_space<vmem>>, vector<1x128xf32>
    %98 = vector.broadcast %97 : vector<1x128xf32> to vector<49x128xf32>
    %99 = arith.addf %96, %98 : vector<49x128xf32>
    %cst_55 = arith.constant 0.000000e+00 : f32
    %100 = vector.broadcast %cst_55 : f32 to vector<49x128xf32>
    %101 = arith.maximumf %99, %100 : vector<49x128xf32>
    %c0_56 = arith.constant 0 : index
    %c0_57 = arith.constant 0 : index
    %c0_58 = arith.constant 0 : index
    %102 = vector.load %arg6[%c0_56, %c0_57, %c0_58] : memref<1x49x128xf32, #tpu.memory_space<vmem>>, vector<1x49x128xf32>
    %103 = vector.shape_cast %102 : vector<1x49x128xf32> to vector<49x128xf32>
    %104 = vector.shape_cast %101 : vector<49x128xf32> to vector<1x49x128xf32>
    tpu.vector_store %arg6[%c0_56, %c0_57, %c0_58], %104 {strides = array<i32>} : memref<1x49x128xf32, #tpu.memory_space<vmem>>, vector<1x49x128xf32>,
    return
  }
  func.func @transform_0(%arg0: i32) -> (i32, i32, i32) {
    %c0_i32 = arith.constant 0 : i32
    %c0_i32_0 = arith.constant 0 : i32
    %c0_i32_1 = arith.constant 0 : i32
    return %arg0, %c0_i32, %c0_i32_0 : i32, i32, i32
  }
  func.func @transform_1(%arg0: i32) -> (i32, i32) {
    %c0_i32 = arith.constant 0 : i32
    %c0_i32_0 = arith.constant 0 : i32
    %c0_i32_1 = arith.constant 0 : i32
    return %c0_i32, %c0_i32_0 : i32, i32
  }
  func.func @transform_2(%arg0: i32) -> (i32, i32) {
    %c0_i32 = arith.constant 0 : i32
    %c0_i32_0 = arith.constant 0 : i32
    %c0_i32_1 = arith.constant 0 : i32
    return %c0_i32, %c0_i32_0 : i32, i32
  }
  func.func @transform_3(%arg0: i32) -> (i32, i32) {
    %c0_i32 = arith.constant 0 : i32
    %c0_i32_0 = arith.constant 0 : i32
    %c0_i32_1 = arith.constant 0 : i32
    return %c0_i32, %c0_i32_0 : i32, i32
  }
  func.func @transform_4(%arg0: i32) -> (i32, i32) {
    %c0_i32 = arith.constant 0 : i32
    %c0_i32_0 = arith.constant 0 : i32
    %c0_i32_1 = arith.constant 0 : i32
    return %c0_i32, %c0_i32_0 : i32, i32
  }
  func.func @transform_5(%arg0: i32) -> (i32, i32, i32) {
    %c0_i32 = arith.constant 0 : i32
    %c0_i32_0 = arith.constant 0 : i32
    %c0_i32_1 = arith.constant 0 : i32
    return %arg0, %c0_i32, %c0_i32_0 : i32, i32, i32
  }
}

</mosaic_0001>

<bundles_post_ra>
// kernel: tpu_custom_call.1
= control target key start
LH: loop header
LB: loop body
LE: loop exit
PB: predicated region body
PF: predicated region fallthrough
CT: control target
= control target key end

     0   :  { %10 = vsyncpa [#allocation5], 0  ;;  %s4096_s0 = inlined_call_operand.hbm [shape: bf16[1,49,896], index: 0, kind: input, shape index: {}]   ;;  %s4097_s1 = inlined_call_operand.hbm [shape: bf16[896,128], index: 1, kind: input, shape index: {}]   ;;  %s4098_s2 = inlined_call_operand.vmem [shape: f32[1,128], index: 2, kind: input, shape index: {}]   ;;  %s4099_s3 = inlined_call_operand.hbm [shape: bf16[1152,128], index: 3, kind: input, shape index: {}]   ;;  %s4100_s4 = inlined_call_operand.vmem [shape: f32[1,128], index: 4, kind: input, shape index: {}]   ;;  %s4101_s5 = inlined_call_operand.vmem [shape: f32[1,49,128], index: 5, kind: output, shape index: {}]  }
   0x1   :  { %11 = vsyncpa [#allocation7], 0  ;;  %s3697_s18 = smov [#allocation6]  }
   0x2   :  { %s29_s19 = sshll.u32 %s3697_s18, 4  ;;  %s30_s19 = int_to_ptr.vmem [resolvable:$true] %s29_s19 }
   0x3   :  { %s3641_s20 = scalar_lea.vmem %s30_s19, 7168  ;;  %p3646_p1 = scmp.lt.s32.totalorder %s30_s19, %s30_s19 }
   0x4   :  { %p3642_p0 = scmp.ne.s32.totalorder %s30_s19, %s3641_s20  ;;  %p3647_p2 = scmp.lt.s32.totalorder %s3641_s20, %s3641_s20 }
   0x6   :  { %p3648_p3 = por %p3647_p2, %p3646_p1 }
   0x8   :  { %p3649_p4 = pnand %p3648_p3, %p3642_p0 }
   0xa   :  { %3652 = shalt.err (!%p3649_p4)
}
   0xb   :  { %s3698_s21 = smov 64   ;;  %s3699_s22 = smov 4  }
   0xc   :  { %35 = dma.hbm_to_vmem [thread:$0]  %s4097_s1, 7168, %s30_s19, [#allocation7], %s3698_s21, %s3698_s21, %s3699_s22  }
   0xd   :  { %s3700_s25 = smov [#allocation4]  }
   0xe   :  { %s17_s26 = sshll.u32 %s3700_s25, 4  ;;  %s18_s26 = int_to_ptr.vmem [resolvable:$true] %s17_s26 }
   0xf   :  { %s3661_s27 = scalar_lea.vmem %s18_s26, 3136  ;;  %p3666_p6 = scmp.lt.s32.totalorder %s18_s26, %s18_s26 }
  0x10   :  { %p3662_p5 = scmp.ne.s32.totalorder %s18_s26, %s3661_s27  ;;  %p3667_p7 = scmp.lt.s32.totalorder %s3661_s27, %s3661_s27 }
  0x12   :  { %p3668_p8 = por %p3667_p7, %p3666_p6 }
  0x14   :  { %p3669_p9 = pnand %p3668_p8, %p3662_p5 }
  0x16   :  { %3672 = shalt.err (!%p3669_p9)
}
  0x17   :  { %s3701_s28 = smov 448   ;;  %s3702_s29 = smov 28  }
  0x18   :  { %23 = dma.hbm_to_vmem [thread:$0]  %s4096_s0, 3136, %s18_s26, [#allocation5], %s3701_s28, %s3701_s28, %s3702_s29  }
  0x19   :  { %s3703_s7 = smov [#allocation8]  }
  0x1a   :  { %s43_s8 = sshll.u32 %s3703_s7, 4  ;;  %s44_s8 = int_to_ptr.vmem [resolvable:$true] %s43_s8 }
  0x1b   :  { %s3681_s1 = scalar_lea.vmem %s44_s8, 9216  ;;  %p3686_p11 = scmp.lt.s32.totalorder %s44_s8, %s44_s8 }
  0x1c   :  { %p3682_p10 = scmp.ne.s32.totalorder %s44_s8, %s3681_s1  ;;  %p3687_p12 = scmp.lt.s32.totalorder %s3681_s1, %s3681_s1 }
  0x1e   :  { %p3688_p13 = por %p3687_p12, %p3686_p11 }
  0x20   :  { %p3689_p0 = pnand %p3688_p13, %p3682_p10 }
  0x22   :  { %3692 = shalt.err (!%p3689_p0)
}
  0x23   :  { %49 = dma.hbm_to_vmem [thread:$0]  %s4099_s3, 9216, %s44_s8, [#allocation7], %s3698_s21, %s3698_s21, %s3699_s22  }
  0x24   :  { %3693 = dma.done.wait [#allocation5], 3136  }
  0x25   :  { %3694 = vsyncadd [#allocation5], 4294964160 }
  0x26   :  { %3695 = dma.done.wait [#allocation7], 16384  }
  0x27   :  { %3696 = vsyncadd [#allocation7], 4294950912  ;;  %v3422_v0 = vld [vmem:[#allocation6 + $0x78] sm:$0xff]   ;;  %v3426_v4 = vld [vmem:[#allocation6 + $0x70] sm:$0xff]   ;;  %vm1161_vm15 = vcmask 1040384  }
  0x28   :  { %v3423_v1 = vld [vmem:[#allocation6 + $0xf8] sm:$0xff]   ;;  %3031 = vmatprep.subr.bf16.mxu0 %v3422_v0  ;;  %v3427_v5 = vld [vmem:[#allocation6 + $0xf0] sm:$0xff]   ;;  %v3430_v8 = vld [vmem:[#allocation6 + $0x68] sm:$0xff]  }
  0x29   :  { %v3424_v2 = vld [vmem:[#allocation6 + $0x38] sm:$0xff]   ;;  %3071 = vmatprep.subr.bf16.mxu1 %v3423_v1  ;;  %v3428_v6 = vld [vmem:[#allocation6 + $0x30] sm:$0xff]   ;;  %v3431_v9 = vld [vmem:[#allocation6 + $0xe8] sm:$0xff]  }
  0x2a   :  { %v3425_v3 = vld [vmem:[#allocation6 + $0xb8] sm:$0xff]   ;;  %3032 = vmatpush3.bf16.msra.mxu0 %v3424_v2  ;;  %v3429_v7 = vld [vmem:[#allocation6 + $0xb0] sm:$0xff]   ;;  %v3432_v10 = vld [vmem:[#allocation6 + $0x28] sm:$0xff]  }
  0x2b   :  { %3072 = vmatpush3.bf16.msra.mxu1 %v3425_v3  ;;  %3033 = vmatprep.subr.bf16.mxu0 %v3426_v4  ;;  %v3433_v11 = vld [vmem:[#allocation6 + $0xa8] sm:$0xff]   ;;  %v3434_v12 = vld [vmem:[#allocation6 + $0x60] sm:$0xff]   ;;  %v3438_v16 = vld [vmem:[#allocation6 + $0x58] sm:$0xff]  }
  0x2c   :  { %3073 = vmatprep.subr.bf16.mxu1 %v3427_v5  ;;  %v3435_v13 = vld [vmem:[#allocation6 + $0xe0] sm:$0xff]   ;;  %v3439_v17 = vld [vmem:[#allocation6 + $0xd8] sm:$0xff]   ;;  %v3442_v20 = vld [vmem:[#allocation6 + $0x50] sm:$0xff]  }
  0x2d   :  { %v3436_v14 = vld [vmem:[#allocation6 + $0x20] sm:$0xff]   ;;  %v3440_v18 = vld [vmem:[#allocation6 + $0x18] sm:$0xff]   ;;  %v3443_v21 = vld [vmem:[#allocation6 + $0xd0] sm:$0xff]  }
  0x2e   :  { %3034 = vmatpush3.bf16.msra.mxu0 %v3428_v6  ;;  %v3437_v15 = vld [vmem:[#allocation6 + $0xa0] sm:$0xff]   ;;  %v3441_v19 = vld [vmem:[#allocation6 + $0x98] sm:$0xff]   ;;  %v3444_v22 = vld [vmem:[#allocation6 + $0x10] sm:$0xff]  }
  0x2f   :  { %3074 = vmatpush3.bf16.msra.mxu1 %v3429_v7  ;;  %3035 = vmatprep.subr.bf16.mxu0 %v3430_v8  ;;  %v3445_v23 = vld [vmem:[#allocation6 + $0x90] sm:$0xff]   ;;  %v3446_v24 = vld [vmem:[#allocation6 + $0x48] sm:$0xff]   ;;  %v3450_v28 = vld [vmem:[#allocation6 + $0x40] sm:$0xff]  }
  0x30   :  { %3075 = vmatprep.subr.bf16.mxu1 %v3431_v9  ;;  %v3447_v25 = vld [vmem:[#allocation6 + $0xc8] sm:$0xff]   ;;  %v3451_v29 = vld [vmem:[#allocation6 + $0xc0] sm:$0xff]   ;;  %v3454_v32 = vld [vmem:[#allocation4] ss:$28 sps:$4 sm:$0xff]  }
  0x31   :  { %v3448_v26 = vld [vmem:[#allocation6 + $0x8] sm:$0xff]   ;;  %v3452_v30 = vld [vmem:[#allocation6] sm:$0xff]   ;;  %v3460_v36 = vld [vmem:[#allocation6 + $0x178] sm:$0xff]  }
  0x32   :  { %3036 = vmatpush3.bf16.msra.mxu0 %v3432_v10  ;;  %v3449_v27 = vld [vmem:[#allocation6 + $0x88] sm:$0xff]   ;;  %v3453_v31 = vld [vmem:[#allocation6 + $0x80] sm:$0xff]   ;;  %v3461_v37 = vld [vmem:[#allocation6 + $0x1b8] sm:$0xff]  }
  0x33   :  { %3076 = vmatpush3.bf16.msra.mxu1 %v3433_v11  ;;  %3037 = vmatprep.subr.bf16.mxu0 %v3434_v12  ;;  %v3456_v33 = vld [vmem:[#allocation4 + $0x4] ss:$28 sps:$4 sm:$0xff]   ;;  %v3459_v35 = vld [vmem:[#allocation4 + $0xc] ss:$28 sps:$4 sm:$0xff]   ;;  %v3463_v39 = vld [vmem:[#allocation6 + $0x170] sm:$0xff]  }
  0x34   :  { %3077 = vmatprep.subr.bf16.mxu1 %v3435_v13  ;;  %v3457_v34 = vld [vmem:[#allocation4 + $0x8] ss:$28 sps:$4 sm:$0xff]   ;;  %712 = vmatprep.mubr.bf16.mxu0 %v3456_v33  ;;  %v3462_v38 = vld [vmem:[#allocation6 + $0x138] sm:$0xff]   ;;  %v3464_v40 = vld [vmem:[#allocation6 + $0x1b0] sm:$0xff]  }
  0x35   :  { %776 = vmatprep.mubr.bf16.mxu1 %v3459_v35  ;;  %v3465_v41 = vld [vmem:[#allocation6 + $0x130] sm:$0xff]   ;;  %v3468_v43 = vld [vmem:[#allocation4 + $0x44] ss:$28 sps:$4 sm:$0xff]   ;;  %v3472_v46 = vld [vmem:[#allocation6 + $0x168] sm:$0xff]  }
  0x36   :  { %3038 = vmatpush3.bf16.msra.mxu0 %v3436_v14  ;;  %v3466_v42 = vld [vmem:[#allocation4 + $0x3c] ss:$28 sps:$4 sm:$0xff]   ;;  %v3473_v47 = vld [vmem:[#allocation6 + $0x1a8] sm:$0xff]   ;;  %v3475_v49 = vld [vmem:[#allocation6 + $0x160] sm:$0xff]  }
  0x37   :  { %3078 = vmatpush3.bf16.msra.mxu1 %v3437_v15  ;;  %3039 = vmatprep.subr.bf16.mxu0 %v3438_v16  ;;  %v3470_v44 = vld [vmem:[#allocation4 + $0x38] ss:$28 sps:$4 sm:$0xff]   ;;  %v3471_v45 = vld [vmem:[#allocation4 + $0x40] ss:$28 sps:$4 sm:$0xff]   ;;  %v3474_v48 = vld [vmem:[#allocation6 + $0x128] sm:$0xff]  }
  0x38   :  { %3079 = vmatprep.subr.bf16.mxu1 %v3439_v17  ;;  %v3476_v50 = vld [vmem:[#allocation6 + $0x1a0] sm:$0xff]   ;;  %v3478_v52 = vld [vmem:[#allocation4 + $0x74] ss:$28 sps:$4 sm:$0xff]   ;;  %v3480_v53 = vld [vmem:[#allocation4 + $0x7c] ss:$28 sps:$4 sm:$0xff]  }
  0x39   :  { %v3477_v51 = vld [vmem:[#allocation6 + $0x120] sm:$0xff]   ;;  %v3482_v54 = vld [vmem:[#allocation4 + $0x70] ss:$28 sps:$4 sm:$0xff]   ;;  %v3483_v55 = vld [vmem:[#allocation4 + $0x78] ss:$28 sps:$4 sm:$0xff]  }
  0x3a   :  { %3040 = vmatpush3.bf16.msra.mxu0 %v3440_v18  ;;  %v3484_v56 = vld [vmem:[#allocation6 + $0x158] sm:$0xff]   ;;  %v3487_v59 = vld [vmem:[#allocation6 + $0x150] sm:$0xff]   ;;  %v88_v62 = vld [vmem:[#allocation4 + $0xa8] sm:$0x11] }
  0x3b   :  { %3080 = vmatpush3.bf16.msra.mxu1 %v3441_v19  ;;  %3041 = vmatprep.subr.bf16.mxu0 %v3442_v20  ;;  %v3485_v57 = vld [vmem:[#allocation6 + $0x198] sm:$0xff]   ;;  %v3488_v60 = vld [vmem:[#allocation6 + $0x190] sm:$0xff]   ;;  %v2734_v0 = vcombine.high %v88_v62, %v88_v62  ;;  %v2733_v2 = vcombine.low %v88_v62, %v88_v62  ;;  %v3494_v4 = vld [vmem:[#allocation6 + $0x148] sm:$0xff]  }
  0x3c   :  { %3081 = vmatprep.subr.bf16.mxu1 %v3443_v21  ;;  %v3486_v58 = vld [vmem:[#allocation6 + $0x118] sm:$0xff]   ;;  %v3489_v61 = vld [vmem:[#allocation6 + $0x110] sm:$0xff]   ;;  %v3495_v5 = vld [vmem:[#allocation6 + $0x188] sm:$0xff]  }
  0x3d   :  { %v89_v63 = vld [vmem:[#allocation4 + $0xb0] sm:$0x11]  ;;  %v3497_v7 = vld [vmem:[#allocation6 + $0x140] sm:$0xff]   ;;  %v3511_v17 = vld [vmem:[#allocation4 + $0xc0] ss:$0 sps:$4 sm:$0x11]  }
  0x3e   :  { %3042 = vmatpush3.bf16.msra.mxu0 %v3444_v22  ;;  %v2736_v1 = vcombine.high %v89_v63, %v89_v63  ;;  %v2735_v3 = vcombine.low %v89_v63, %v89_v63  ;;  %v3496_v6 = vld [vmem:[#allocation6 + $0x108] sm:$0xff]   ;;  %v3498_v8 = vld [vmem:[#allocation6 + $0x180] sm:$0xff]   ;;  %v3503_v12 = vld [vmem:[#allocation4 + $0x18] ss:$28 sps:$4 sm:$0xff]  }
  0x3f   :  { %3082 = vmatpush3.bf16.msra.mxu1 %v3445_v23  ;;  %3043 = vmatprep.subr.bf16.mxu0 %v3446_v24  ;;  %v3499_v9 = vld [vmem:[#allocation6 + $0x100] sm:$0xff]   ;;  %v3500_v10 = vld [vmem:[#allocation4 + $0x10] ss:$28 sps:$4 sm:$0xff]   ;;  %v90_v19 = vld [vmem:[#allocation4 + $0xb8] sm:$0x11]  ;;  %v950_v23 = vlaneseq }
  0x40   :  { %3083 = vmatprep.subr.bf16.mxu1 %v3447_v25  ;;  %v3502_v11 = vld [vmem:[#allocation4 + $0x14] ss:$28 sps:$4 sm:$0xff]   ;;  %v3505_v14 = vld [vmem:[#allocation4 + $0x4c] ss:$28 sps:$4 sm:$0xff]   ;;  %v3509_v18 = vld [vmem:[#allocation4 + $0x84] ss:$28 sps:$4 sm:$0xff]   ;;  %v2738_v21 = vcombine.high %v90_v19, %v90_v19  ;;  %v2737_v22 = vcombine.low %v90_v19, %v90_v19 }
  0x41   :  { %v3504_v13 = vld [vmem:[#allocation4 + $0x50] ss:$28 sps:$4 sm:$0xff]   ;;  %v3508_v15 = vld [vmem:[#allocation4 + $0x88] ss:$28 sps:$4 sm:$0xff]   ;;  %v3512_v20 = vld [vmem:[#allocation4 + $0x80] ss:$28 sps:$4 sm:$0xff]  }
  0x42   :  { %3044 = vmatpush3.bf16.msra.mxu0 %v3448_v26  ;;  %v3507_v16 = vld [vmem:[#allocation4 + $0x48] ss:$28 sps:$4 sm:$0xff]   ;;  %v3746_v24 = vshrl.u32 %v950_v23, 7  ;;  %v3523_v63 = vld [vmem:[#allocation8 + $0x68] sm:$0xff]   ;;  %v3532_v23 = vld [vmem:[#allocation8 + $0x18] sm:$0xff]  }
  0x43   :  { %3084 = vmatpush3.bf16.msra.mxu1 %v3449_v27  ;;  %3045 = vmatprep.subr.bf16.mxu0 %v3450_v28 }
  0x44   :  { %3085 = vmatprep.subr.bf16.mxu1 %v3451_v29  ;;  %v952_v25 = vadd.s32 8, %v3746_v24  ;;  %v953_v28 = vadd.s32 16, %v3746_v24  ;;  %v3704_v29 = vmov 0  }
  0x46   :  { %3046 = vmatpush3.bf16.msra.mxu0 %v3452_v30  ;;  %v3749_v26 = vmul.u32.u64.low 2454267026, %v952_v25  ;;  %v3750_v27 = vmul.u32.u64.high 2454267026, %v952_v25, %v3749_v26 }
  0x47   :  { %3086 = vmatpush3.bf16.msra.mxu1 %v3453_v31  ;;  %3111 = vmatprep.subr.bf16.mxu0 %v3460_v36 }
  0x48   :  { %3335 = vmatprep.subr.bf16.mxu1 %v3461_v37  ;;  %vm978_vm0 = vc.u32 %v3749_v26, 2454267026 }
  0x49   :  { %713 = vmatmul.mubr.bf16.vlgmr.msra.gmra.mxu0 %v3454_v32  ;;  %v979_v30 = vsel %vm978_vm0, 1, %v3704_v29  ;;  %v3755_v31 = vmul.u32.u64.low 2454267026, %v3746_v24  ;;  %v3756_v32 = vmul.u32.u64.high 2454267026, %v3746_v24, %v3755_v31  ;;  %vm1162_vm0 = vsmask.f32 256 }
  0x4a   :  { %777 = vmatmul.mubr.bf16.vlgmr.msra.gmra.mxu1 %v3457_v34  ;;  %3112 = vmatpush3.bf16.msra.mxu0 %v3462_v38  ;;  %v980_v33 = vadd.s32 %v3750_v27, %v979_v30  ;;  %v3759_v34 = vmul.u32.u64.low 2454267026, %v953_v28  ;;  %v3760_v35 = vmul.u32.u64.high 2454267026, %v953_v28, %v3759_v34 }
  0x4b   :  { %3336 = vmatpush3.bf16.msra.mxu1 %v3461_v37  ;;  %3113 = vmatprep.subr.bf16.mxu0 %v3463_v39  ;;  %vm964_vm1 = vc.u32 %v3755_v31, 2454267026  ;;  %v3515_v37 = vld [vmem:[#allocation8 + $0x78] sm:$0xff]   ;;  %v957_v31 = vadd.s32 48, %v3746_v24 }
  0x4c   :  { %3337 = vmatprep.subr.bf16.mxu1 %v3464_v40  ;;  %720 = vmatprep.mubr.bf16.mxu0 %v3466_v42  ;;  %v981_v36 = vshrl.u32 %v980_v33, 2  ;;  %v965_v38 = vsel %vm964_vm1, 1, %v3704_v29  ;;  %v3516_v39 = vld [vmem:[#allocation8 + $0x38] sm:$0xff]   ;;  %vm992_vm2 = vc.u32 %v3759_v34, 2454267026  ;;  %vm3809_vm1 = vmand %vm1161_vm15, %vm1162_vm0 }
  0x4d   :  { %784 = vmatprep.mubr.bf16.mxu1 %v3468_v43  ;;  %v993_v43 = vsel %vm992_vm2, 1, %v3704_v29 }
  0x4e   :  { %3114 = vmatpush3.bf16.msra.mxu0 %v3465_v41  ;;  %v966_v41 = vadd.s32 %v3756_v32, %v965_v38  ;;  %v982_v42 = vmul.u32 7, %v981_v36  ;;  %v3534_v32 = vld [vmem:[#allocation8 + $0x98] sm:$0xff]   ;;  %v3535_v36 = vld [vmem:[#allocation8 + $0x50] sm:$0xff]  }
  0x4f   :  { %3338 = vmatpush3.bf16.msra.mxu1 %v3464_v40  ;;  %3115 = vmatprep.subr.bf16.mxu0 %v3472_v46  ;;  %v3517_v40 = vld [vmem:[#allocation8 + $0xf8] sm:$0xff]   ;;  %v954_v46 = vadd.s32 24, %v3746_v24  ;;  %v3536_v38 = vld [vmem:[#allocation8 + $0x10] sm:$0xff]  }
  0x50   :  { %3339 = vmatprep.subr.bf16.mxu1 %v3473_v47 }
  0x51   :  { %721 = vmatmul.mubr.bf16.gmra.mxu0 %v3470_v44  ;;  %v3705_v44 = vmov 0.0  }
  0x52   :  { %785 = vmatmul.mubr.bf16.gmra.mxu1 %v3471_v45  ;;  %3116 = vmatpush3.bf16.msra.mxu0 %v3474_v48  ;;  %62 = vst [vmem:[#allocation2] sm:$0xff] %v3705_v44  ;;  %63 = vst [vmem:[#allocation2 + $0x39] sm:$0xff] %v3705_v44  ;;  %v994_v45 = vadd.s32 %v3760_v35, %v993_v43  ;;  %v3767_v48 = vsub.s32 %v952_v25, %v982_v42  ;;  %v3533_v25 = vld [vmem:[#allocation8 + $0xd8] sm:$0xff]   ;;  %v3797_v34 = vmul.u32.u64.low 2454267026, %v957_v31  ;;  %v3798_v35 = vmul.u32.u64.high 2454267026, %v957_v31, %v3797_v34  ;;  %v3539_v43 = vld [vmem:[#allocation8 + $0x48] sm:$0xff]  }
  0x53   :  { %3340 = vmatpush3.bf16.msra.mxu1 %v3473_v47  ;;  %3117 = vmatprep.subr.bf16.mxu0 %v3475_v49  ;;  %v967_v47 = vshrl.u32 %v966_v41, 2  ;;  %v3518_v49 = vld [vmem:[#allocation8 + $0xb8] sm:$0xff]   ;;  %v3538_v41 = vld [vmem:[#allocation8 + $0x90] sm:$0xff]   ;;  %v3540_v44 = vld [vmem:[#allocation8 + $0x8] sm:$0xff]  }
  0x54   :  { %3341 = vmatprep.subr.bf16.mxu1 %v3476_v50  ;;  %728 = vmatprep.mubr.bf16.mxu0 %v3478_v52  ;;  %vm1048_vm10 = vc.u32 %v3797_v34, 2454267026 }
  0x55   :  { %792 = vmatprep.mubr.bf16.mxu1 %v3480_v53  ;;  %v968_v53 = vmul.u32 7, %v967_v47  ;;  %v1049_v42 = vsel %vm1048_vm10, 1, %v3704_v29  ;;  %v3542_v47 = vld [vmem:[#allocation8 + $0x88] sm:$0xff]  }
  0x56   :  { %3118 = vmatpush3.bf16.msra.mxu0 %v3477_v51  ;;  %v3769_v51 = vmul.u32.u64.low 2454267026, %v954_v46  ;;  %v3770_v52 = vmul.u32.u64.high 2454267026, %v954_v46, %v3769_v51 }
  0x57   :  { %3342 = vmatpush3.bf16.msra.mxu1 %v3476_v50  ;;  %3119 = vmatprep.subr.bf16.mxu0 %v3484_v56  ;;  %v995_v50 = vshrl.u32 %v994_v45, 2  ;;  %v3520_v56 = vld [vmem:[#allocation8 + $0x30] sm:$0xff]   ;;  %v3541_v45 = vld [vmem:[#allocation8 + $0xc8] sm:$0xff]  }
  0x58   :  { %3343 = vmatprep.subr.bf16.mxu1 %v3485_v57  ;;  %vm1006_vm3 = vc.u32 %v3769_v51, 2454267026  ;;  %v3544_v51 = vld [vmem:[#allocation8] sm:$0xff]  }
  0x59   :  { %729 = vmatmul.mubr.bf16.gmra.mxu0 %v3482_v54  ;;  %v3519_v54 = vld [vmem:[#allocation8 + $0x70] sm:$0xff]  }
  0x5a   :  { %793 = vmatmul.mubr.bf16.gmra.mxu1 %v3483_v55  ;;  %3120 = vmatpush3.bf16.msra.mxu0 %v3486_v58  ;;  %v996_v55 = vmul.u32 7, %v995_v50  ;;  %v969_v58 = vsub.s32 %v3746_v24, %v968_v53  ;;  %v3553_v53 = vld [vmem:[#allocation8 + $0x178] sm:$0xff]  }
  0x5b   :  { %3344 = vmatpush3.bf16.msra.mxu1 %v3485_v57  ;;  %3121 = vmatprep.subr.bf16.mxu0 %v3487_v59  ;;  %v3521_v57 = vld [vmem:[#allocation8 + $0xf0] sm:$0xff]  }
  0x5c   :  { %3345 = vmatprep.subr.bf16.mxu1 %v3488_v60  ;;  %736 = vmatprep.mubr.bf16.mxu0 %v2734_v0  ;;  %v3522_v59 = vld [vmem:[#allocation8 + $0xb0] sm:$0xff]   ;;  %v955_v0 = vadd.s32 32, %v3746_v24  ;;  %vm1056_vm4 = vcmp.ne.s32.totalorder %v969_v58, 0  ;;  %vm1063_vm5 = vcmp.lt.s32.totalorder %v969_v58, 0 }
  0x5d   :  { %800 = vmatprep.mubr.bf16.mxu1 %v2736_v1  ;;  %v3524_v1 = vld [vmem:[#allocation8 + $0x28] sm:$0xff]   ;;  %vm1070_vm7 = vmand %vm1063_vm5, %vm1056_vm4  ;;  %vm1064_vm4 = vcmp.lt.s32.totalorder %v3767_v48, 0 }
  0x5e   :  { %3122 = vmatpush3.bf16.msra.mxu0 %v3489_v61  ;;  %v3774_v61 = vsub.s32 %v953_v28, %v996_v55  ;;  %v3555_v55 = vld [vmem:[#allocation8 + $0x1f8] sm:$0xff]  }
  0x5f   :  { %3346 = vmatpush3.bf16.msra.mxu1 %v3488_v60  ;;  %3123 = vmatprep.subr.bf16.mxu0 %v3494_v4  ;;  %v1007_v60 = vsel %vm1006_vm3, 1, %v3704_v29  ;;  %v3526_v4 = vld [vmem:[#allocation8 + $0xa8] sm:$0xff]   ;;  %vm1057_vm3 = vcmp.ne.s32.totalorder %v3767_v48, 0 }
  0x60   :  { %3347 = vmatprep.subr.bf16.mxu1 %v3495_v5  ;;  %v1008_v62 = vadd.s32 %v3770_v52, %v1007_v60  ;;  %v3545_v52 = vld [vmem:[#allocation8 + $0xc0] sm:$0xff]   ;;  %vm1071_vm5 = vmand %vm1064_vm4, %vm1057_vm3 }
  0x61   :  { %737 = vmatmul.mubr.bf16.gmra.mxu0 %v2733_v2  ;;  %v3525_v2 = vld [vmem:[#allocation8 + $0xe8] sm:$0xff]  }
  0x62   :  { %801 = vmatmul.mubr.bf16.gmra.mxu1 %v2735_v3  ;;  %3124 = vmatpush3.bf16.msra.mxu0 %v3496_v6  ;;  %v1009_v3 = vshrl.u32 %v1008_v62, 2  ;;  %v3588_v62 = vld [vmem:[#allocation8 + $0x110] sm:$0xff]  }
  0x63   :  { %3348 = vmatpush3.bf16.msra.mxu1 %v3495_v5  ;;  %3125 = vmatprep.subr.bf16.mxu0 %v3497_v7  ;;  %v3778_v5 = vmul.u32.u64.low 2454267026, %v955_v0  ;;  %v3779_v6 = vmul.u32.u64.high 2454267026, %v955_v0, %v3778_v5 }
  0x64   :  { %3349 = vmatprep.subr.bf16.mxu1 %v3498_v8  ;;  %840 = vmatprep.mubr.bf16.mxu0 %v3502_v11  ;;  %v1010_v7 = vmul.u32 7, %v1009_v3  ;;  %v3528_v11 = vld [vmem:[#allocation8 + $0x20] sm:$0xff]   ;;  %v1492_v3 = vld [vmem:[#allocation2 + $0x3f] sm:$0x1] }
  0x65   :  { %3351 = vmatprep.mubr.bf16.mxu1 %v3503_v12  ;;  %vm1020_vm6 = vc.u32 %v3778_v5, 2454267026  ;;  %v3529_v12 = vld [vmem:[#allocation8 + $0xe0] sm:$0xff]   ;;  %v3023_v5 = vpack.c.bf16 %v1492_v3, %v1492_v3  ;;  %v1079_v3 = vadd.s32 7, %v3774_v61 }
  0x66   :  { %3126 = vmatpush3.bf16.msra.mxu0 %v3499_v9  ;;  %v3527_v9 = vld [vmem:[#allocation8 + $0x60] sm:$0xff]  }
  0x67   :  { %3350 = vmatpush3.bf16.msra.mxu1 %v3498_v8  ;;  %3163 = vmatprep.subr.bf16.mxu0 %v3515_v37  ;;  %v1077_v8 = vadd.s32 7, %v969_v58  ;;  %v3706_v37 = vmov 0.0|0.0  }
  0x68   :  { %3203 = vmatprep.subr.bf16.mxu1 %v3517_v40  ;;  %1155 = vst [vmem:[#allocation3] sm:$0xf] %v3706_v37 }
  0x69   :  { %841 = vmatmul.mubr.bf16.vlgmr.msra.gmra.mxu0 %v3500_v10  ;;  %v956_v10 = vadd.s32 40, %v3746_v24  ;;  %v3789_v19 = vsel %vm1070_vm7, %v1077_v8, %v969_v58  ;;  %v1050_v24 = vadd.s32 %v3798_v35, %v1049_v42  ;;  %v1388_v58 = vld [vmem:[#allocation2 + $0x39] sm:$0x1]  ;;  %v1537_v8 = vld [vmem:[#allocation2 + $0x40] sm:$0x1]  ;;  %vm1065_vm7 = vcmp.lt.s32.totalorder %v3774_v61, 0 }
  0x6a   :  { %3352 = vmatmul.mubr.bf16.vlgmr.msra.gmra.mxu1 %v3504_v13  ;;  %848 = vmatprep.mubr.bf16.mxu0 %v3505_v14  ;;  %v3782_v13 = vsub.s32 %v954_v46, %v1010_v7  ;;  %v1021_v14 = vsel %vm1020_vm6, 1, %v3704_v29  ;;  %vm1098_vm9 = vcmp.ge.s32.totalorder %v3789_v19, 1  ;;  %v1528_v7 = vld [vmem:[#allocation3 + $0xf4] sm:$0x1]  ;;  %vm1058_vm6 = vcmp.ne.s32.totalorder %v3774_v61, 0 }
  0x6b   :  { %3355 = vmatprep.mubr.bf16.mxu1 %v3508_v15  ;;  %3164 = vmatpush3.bf16.msra.mxu0 %v3516_v39  ;;  %v1022_v15 = vadd.s32 %v3779_v6, %v1021_v14  ;;  %v3537_v39 = vld [vmem:[#allocation8 + $0xd0] sm:$0xff]   ;;  %v1051_v46 = vshrl.u32 %v1050_v24, 2 }
  0x6c   :  { %3204 = vmatpush3.bf16.msra.mxu1 %v3518_v49  ;;  %3165 = vmatprep.subr.bf16.mxu0 %v3519_v54  ;;  %v3543_v49 = vld [vmem:[#allocation8 + $0x40] sm:$0xff]   ;;  %v1483_v6 = vld [vmem:[#allocation3 + $0xf0] sm:$0x1]  ;;  %vm1066_vm10 = vcmp.lt.s32.totalorder %v3782_v13, 0 }
  0x6d   :  { %3205 = vmatprep.subr.bf16.mxu1 %v3521_v57  ;;  %v1052_v50 = vmul.u32 7, %v1051_v46 }
  0x6f   :  { %3166 = vmatpush3.bf16.msra.mxu0 %v3520_v56  ;;  %v1053_v54 = vsub.s32 %v957_v31, %v1052_v50 }
  0x70   :  { %3206 = vmatpush3.bf16.msra.mxu1 %v3522_v59  ;;  %3167 = vmatprep.subr.bf16.mxu0 %v3523_v63  ;;  %v1431_v63 = vld [vmem:[#allocation3 + $0xec] sm:$0x1] }
  0x71   :  { %849 = vmatmul.mubr.bf16.gmra.mxu0 %v3507_v16  ;;  %3207 = vmatprep.subr.bf16.mxu1 %v3525_v2  ;;  %vm1062_vm11 = vcmp.ne.s32.totalorder %v1053_v54, 0  ;;  %vm1069_vm12 = vcmp.lt.s32.totalorder %v1053_v54, 0  ;;  %v1083_v56 = vadd.s32 7, %v1053_v54 }
  0x72   :  { %3356 = vmatmul.mubr.bf16.gmra.mxu1 %v3511_v17  ;;  %856 = vmatprep.mubr.bf16.mxu0 %v3509_v18  ;;  %v3786_v16 = vmul.u32.u64.low 2454267026, %v956_v10  ;;  %v3787_v17 = vmul.u32.u64.high 2454267026, %v956_v10, %v3786_v16  ;;  %v3530_v18 = vld [vmem:[#allocation8 + $0xa0] sm:$0xff]   ;;  %vm1076_vm13 = vmand %vm1069_vm12, %vm1062_vm11 }
  0x73   :  { %3168 = vmatpush3.bf16.msra.mxu0 %v3524_v1  ;;  %v3804_v57 = vsel %vm1076_vm13, %v1083_v56, %v1053_v54  ;;  %v1440_v1 = vld [vmem:[#allocation2 + $0x3e] sm:$0x1]  ;;  %v1078_v54 = vadd.s32 7, %v3767_v48  ;;  %vm1072_vm12 = vmand %vm1065_vm7, %vm1058_vm6  ;;  %vm1219_vm13 = vcmp.le.s32.totalorder %v3789_v19, 5 }
  0x74   :  { %3208 = vmatpush3.bf16.msra.mxu1 %v3526_v4  ;;  %3169 = vmatprep.subr.bf16.mxu0 %v3527_v9  ;;  %vm1034_vm8 = vc.u32 %v3786_v16, 2454267026  ;;  %vm1225_vm14 = vcmp.le.s32.totalorder %v3804_v57, 5  ;;  %vm1104_vm2 = vcmp.ge.s32.totalorder %v3804_v57, 1 }
  0x75   :  { %3209 = vmatprep.subr.bf16.mxu1 %v3529_v12  ;;  %v1395_v59 = vsel %vm1225_vm14, %v1388_v58, 0.0  ;;  %v1447_v2 = vsel %vm1104_vm2, %v1440_v1, 0.0  ;;  %v1544_v14 = vsel %vm1225_vm14, %v1537_v8, 0.0 }
  0x76   :  { %v3009_v60 = vpack.c.bf16 %v1395_v59, %v1395_v59  ;;  %v3016_v4 = vpack.c.bf16 %v1447_v2, %v1447_v2 }
  0x77   :  { %3170 = vmatpush3.bf16.msra.mxu0 %v3528_v11 }
  0x78   :  { %3210 = vmatpush3.bf16.msra.mxu1 %v3530_v18  ;;  %v1484_v9 = vsel %vm3809_vm1, %v3016_v4, %v1483_v6  ;;  %v3030_v18 = vpack.c.bf16 %v1544_v14, %v1544_v14 }
  0x79   :  { %857 = vmatmul.mubr.bf16.gmra.mxu0 %v3512_v20  ;;  %v1023_v20 = vshrl.u32 %v1022_v15, 2  ;;  %3211 = vmatprep.subr.bf16.mxu1 %v3533_v25  ;;  %1485 = vst [vmem:[#allocation3 + $0xf0] sm:$0x1] %v1484_v9 }
  0x7a   :  { %864 = vmatprep.mubr.bf16.mxu0 %v2738_v21  ;;  %v3531_v21 = vld [vmem:[#allocation8 + $0x58] sm:$0xff]  }
  0x7b   :  { %v1024_v26 = vmul.u32 7, %v1023_v20  ;;  %3171 = vmatprep.subr.bf16.mxu0 %v3531_v21 }
  0x7c   :  { %3172 = vmatpush3.bf16.msra.mxu0 %v3532_v23  ;;  %3212 = vmatpush3.bf16.msra.mxu1 %v3534_v32  ;;  %v1580_v23 = vld [vmem:[#allocation3 + $0xf8] sm:$0x1] }
  0x7d   :  { %v3794_v28 = vsub.s32 %v955_v0, %v1024_v26  ;;  %3173 = vmatprep.subr.bf16.mxu0 %v3535_v36  ;;  %3213 = vmatprep.subr.bf16.mxu1 %v3537_v39  ;;  %v1432_v0 = vsel %vm3809_vm1, %v3009_v60, %v1431_v63  ;;  %v1581_v25 = vsel %vm3809_vm1, %v3030_v18, %v1580_v23 }
  0x7e   :  { %1433 = vst [vmem:[#allocation3 + $0xec] sm:$0x1] %v1432_v0  ;;  %1582 = vst [vmem:[#allocation3 + $0xf8] sm:$0x1] %v1581_v25  ;;  %v3866_v63 = vsel %vm1071_vm5, %v1078_v54, %v3767_v48 }
  0x7f   :  { %vm1099_vm11 = vcmp.ge.s32.totalorder %v3866_v63, 1  ;;  %vm1060_vm0 = vcmp.ne.s32.totalorder %v3794_v28, 0  ;;  %vm1067_vm3 = vcmp.lt.s32.totalorder %v3794_v28, 0 }
  0x80   :  { %3174 = vmatpush3.bf16.msra.mxu0 %v3536_v38  ;;  %3214 = vmatpush3.bf16.msra.mxu1 %v3538_v41  ;;  %vm3907_vm6 = vmand %vm1067_vm3, %vm1060_vm0 }
  0x81   :  { %865 = vmatmul.mubr.bf16.gmra.mxu0 %v2737_v22  ;;  %v1035_v22 = vsel %vm1034_vm8, 1, %v3704_v29  ;;  %3175 = vmatprep.subr.bf16.mxu0 %v3539_v43  ;;  %v3546_v29 = vld [vmem:[#allocation8 + $0x80] sm:$0xff]   ;;  %vm1059_vm8 = vcmp.ne.s32.totalorder %v3782_v13, 0 }
  0x82   :  { %v1036_v27 = vadd.s32 %v3787_v17, %v1035_v22  ;;  %3215 = vmatprep.subr.bf16.mxu1 %v3541_v45  ;;  %vm3882_vm15 = vmand %vm1066_vm10, %vm1059_vm8  ;;  %vm1220_vm8 = vcmp.le.s32.totalorder %v3866_v63, 5 }
  0x84   :  { %v1037_v30 = vshrl.u32 %v1036_v27, 2  ;;  %3176 = vmatpush3.bf16.msra.mxu0 %v3540_v44  ;;  %3216 = vmatpush3.bf16.msra.mxu1 %v3542_v47 }
  0x85   :  { %3177 = vmatprep.subr.bf16.mxu0 %v3543_v49  ;;  %3217 = vmatprep.subr.bf16.mxu1 %v3545_v52  ;;  %v3859_v52 = vld [vmem:[%s4098_s2] ss:$0 sm:$0xff] }
  0x86   :  { %v1038_v33 = vmul.u32 7, %v1037_v30 }
  0x88   :  { %v3800_v40 = vsub.s32 %v956_v10, %v1038_v33  ;;  %3178 = vmatpush3.bf16.msra.mxu0 %v3544_v51  ;;  %3218 = vmatpush3.bf16.msra.mxu1 %v3546_v29  ;;  %v1529_v10 = vsel %vm3809_vm1, %v3023_v5, %v1528_v7 }
  0x89   :  { %3243 = vmatprep.subr.bf16.mxu0 %v3553_v53  ;;  %3283 = vmatprep.subr.bf16.mxu1 %v3555_v55  ;;  %1530 = vst [vmem:[#allocation3 + $0xf4] sm:$0x1] %v1529_v10  ;;  %v1080_v10 = vadd.s32 7, %v3782_v13 }
  0x8a   :  { %vm1061_vm4 = vcmp.ne.s32.totalorder %v3800_v40, 0  ;;  %vm1068_vm5 = vcmp.lt.s32.totalorder %v3800_v40, 0 }
  0x8b   :  { %vm3922_vm10 = vmand %vm1068_vm5, %vm1061_vm4 }
 0x109   :  { %v3047_v11 = vpop.f32.mrf.mxu0 }
 0x10a   :  { %v3087_v12 = vpop.f32.mrf.mxu1 }
 0x10b   :  { %v3048_v15 = vpop.f32.mrf.mxu0 }
 0x10c   :  { %v3088_v16 = vpop.f32.mrf.mxu1  ;;  %v3049_v49 = vadd.f32 %v3048_v15, %v3047_v11 }
 0x10d   :  { %v3050_v17 = vpop.f32.mrf.mxu0  ;;  %v3089_v56 = vadd.f32 %v3088_v16, %v3087_v12 }
 0x10e   :  { %v3090_v20 = vpop.f32.mrf.mxu1  ;;  %v715_v55 = vadd.f32 %v3049_v49, %v3859_v52  ;;  %v1082_v49 = vadd.s32 7, %v3800_v40 }
 0x10f   :  { %v3051_v21 = vpop.f32.mrf.mxu0 }
 0x110   :  { %v3091_v22 = vpop.f32.mrf.mxu1  ;;  %v3052_v58 = vadd.f32 %v3051_v21, %v3050_v17  ;;  %v779_v4 = vadd.f32 %v3089_v56, %v715_v55  ;;  %v3889_v21 = vsel %vm1072_vm12, %v1079_v3, %v3774_v61  ;;  %v3901_v61 = vsel %vm3882_vm15, %v1080_v10, %v3782_v13 }
 0x111   :  { %v3053_v26 = vpop.f32.mrf.mxu0  ;;  %v3092_v8 = vadd.f32 %v3091_v22, %v3090_v20  ;;  %vm1100_vm7 = vcmp.ge.s32.totalorder %v3889_v21, 1  ;;  %vm1101_vm12 = vcmp.ge.s32.totalorder %v3901_v61, 1  ;;  %vm1221_vm15 = vcmp.le.s32.totalorder %v3889_v21, 5 }
 0x112   :  { %v3093_v27 = vpop.f32.mrf.mxu1  ;;  %v718_v5 = vadd.f32 %v3052_v58, %v3859_v52  ;;  %vm1222_vm3 = vcmp.le.s32.totalorder %v3901_v61, 5  ;;  %v3573_v61 = vld [vmem:[#allocation8 + $0x1e0] sm:$0xff]  }
 0x113   :  { %v3054_v30 = vpop.f32.mrf.mxu0 }
 0x114   :  { %v3094_v31 = vpop.f32.mrf.mxu1  ;;  %v3055_v0 = vadd.f32 %v3054_v30, %v3053_v26  ;;  %v782_v17 = vadd.f32 %v3092_v8, %v718_v5  ;;  %v1081_v26 = vadd.s32 7, %v3794_v28 }
 0x115   :  { %v3826_v32 = vpop.f32.mrf.mxu0  ;;  %v3095_v12 = vadd.f32 %v3094_v31, %v3093_v27 }
 0x116   :  { %v3828_v33 = vpop.f32.mrf.mxu1  ;;  %v723_v11 = vadd.f32 %v3055_v0, %v3859_v52 }
 0x117   :  { %v3057_v34 = vpop.f32.mrf.mxu0 }
 0x118   :  { %v3830_v35 = vpop.f32.mrf.mxu1  ;;  %v3058_v22 = vadd.f32 %v3057_v34, %v3826_v32  ;;  %v787_v34 = vadd.f32 %v3095_v12, %v723_v11 }
 0x119   :  { %v3832_v36 = vpop.f32.mrf.mxu0 }
 0x11a   :  { %v3834_v37 = vpop.f32.mrf.mxu1  ;;  %v726_v54 = vadd.f32 %v3058_v22, %v3859_v52 }
 0x11b   :  { %v3060_v38 = vpop.f32.mrf.mxu0 }
 0x11c   :  { %v3836_v39 = vpop.f32.mrf.mxu1  ;;  %v3061_v27 = vadd.f32 %v3060_v38, %v3832_v36 }
 0x11d   :  { %v3838_v41 = vpop.f32.mrf.mxu0 }
 0x11e   :  { %v3840_v42 = vpop.f32.mrf.mxu1  ;;  %v731_v0 = vadd.f32 %v3061_v27, %v3859_v52 }
 0x11f   :  { %v3842_v24 = vpop.f32.mrf.mxu0 }
 0x120   :  { %v3844_v43 = vpop.f32.mrf.mxu1  ;;  %v3064_v5 = vadd.f32 %v3842_v24, %v3838_v41 }
 0x121   :  { %v3846_v44 = vpop.f32.mrf.mxu0 }
 0x122   :  { %v3848_v45 = vpop.f32.mrf.mxu1  ;;  %v734_v11 = vadd.f32 %v3064_v5, %v3859_v52 }
 0x123   :  { %v3850_v46 = vpop.f32.mrf.mxu0 }
 0x124   :  { %v3852_v47 = vpop.f32.mrf.mxu1 }
 0x125   :  { %v3068_v50 = vpop.f32.mrf.mxu0 }
 0x126   :  { %v3108_v51 = vpop.f32.mrf.mxu1 }
 0x127   :  { %v3069_v29 = vpop.f32.mrf.mxu0 }
 0x128   :  { %v3109_v53 = vpop.f32.mrf.mxu1 }
 0x129   :  { %v3127_v59 = vpop.f32.mrf.mxu0 }
 0x12a   :  { %v3863_v60 = vpop.f32.mrf.mxu1 }
 0x12b   :  { %v3128_v1 = vpop.f32.mrf.mxu0 }
 0x12c   :  { %v906_v2 = vpop.f32.mrf.mxu1  ;;  %v3129_v6 = vadd.f32 %v3128_v1, %v3127_v59  ;;  %v3931_v59 = vsel %vm3907_vm6, %v1081_v26, %v3794_v28  ;;  %v3101_v1 = vadd.f32 %v3836_v39, %v3834_v37  ;;  %v3946_v37 = vsel %vm3922_vm10, %v1082_v49, %v3800_v40 }
 0x12d   :  { %v3130_v48 = vpop.f32.mrf.mxu0  ;;  %v3104_v40 = vadd.f32 %v3844_v43, %v3840_v42  ;;  %vm1102_vm0 = vcmp.ge.s32.totalorder %v3931_v59, 1  ;;  %vm1103_vm4 = vcmp.ge.s32.totalorder %v3946_v37, 1  ;;  %vm1223_vm5 = vcmp.le.s32.totalorder %v3931_v59, 5 }
 0x12e   :  { %v3875_v7 = vpop.f32.mrf.mxu1  ;;  %v843_v9 = vadd.f32 %v3129_v6, %v779_v4  ;;  %v3098_v4 = vadd.f32 %v3830_v35, %v3828_v33  ;;  %v3067_v6 = vadd.f32 %v3850_v46, %v3846_v44 }
 0x12f   :  { %v3131_v14 = vpop.f32.mrf.mxu0 }
 0x130   :  { %v909_v15 = vpop.f32.mrf.mxu1  ;;  %v907_v18 = vadd.f32 %v906_v2, %v843_v9  ;;  %v3132_v20 = vadd.f32 %v3131_v14, %v3130_v48  ;;  %v790_v24 = vadd.f32 %v3098_v4, %v726_v54  ;;  %v795_v9 = vadd.f32 %v3101_v1, %v731_v0 }
 0x131   :  { %v3133_v23 = vpop.f32.mrf.mxu0  ;;  %v739_v12 = vadd.f32 %v3067_v6, %v3859_v52 }
 0x132   :  { %v3892_v25 = vpop.f32.mrf.mxu1  ;;  %v936_v30 = vmax.f32 %v907_v18, 0.0  ;;  %v846_v31 = vadd.f32 %v3132_v20, %v782_v17 }
 0x133   :  { %v3134_v36 = vpop.f32.mrf.mxu0 }
 0x134   :  { %v3913_v38 = vpop.f32.mrf.mxu1  ;;  %943 = vst [vmem:[#allocation2 + $0x8] sm:$0xff] %v936_v30  ;;  %v1120_v13 = vsel %vm1099_vm11, %v936_v30, 0.0  ;;  %v2996_v50 = vpack.c.bf16 %v936_v30, %v936_v30  ;;  %v910_v51 = vadd.f32 %v909_v15, %v846_v31  ;;  %v3135_v29 = vadd.f32 %v3134_v36, %v3133_v23 }
 0x135   :  { %v2969_v55 = vpack.c.bf16 %v1120_v13, %v1120_v13  ;;  %v3136_v56 = vpop.f32.mrf.mxu0 }
 0x136   :  { %v3358_v58 = vpop.f32.mrf.mxu1  ;;  %1373 = vst [vmem:[#allocation3 + $0x10] sm:$0xf] %v2996_v50  ;;  %v937_v2 = vmax.f32 %v910_v51, 0.0  ;;  %v851_v3 = vadd.f32 %v3135_v29, %v787_v34  ;;  %v798_v34 = vadd.f32 %v3104_v40, %v734_v11 }
 0x137   :  { %1156 = vst [vmem:[#allocation3 + $0x24] sm:$0xf] %v2969_v55  ;;  %v3137_v28 = vpop.f32.mrf.mxu0 }
 0x138   :  { %944 = vst [vmem:[#allocation2 + $0x10] sm:$0xff] %v937_v2  ;;  %v1121_v39 = vsel %vm1100_vm7, %v937_v2, 0.0  ;;  %v2997_v33 = vpack.c.bf16 %v937_v2, %v937_v2  ;;  %v1538_v35 = vsel %vm1219_vm13, %v937_v2, 0.0  ;;  %v915_v41 = vadd.f32 %v3863_v60, %v851_v3 }
 0x139   :  { %v2970_v44 = vpack.c.bf16 %v1121_v39, %v1121_v39  ;;  %v3024_v46 = vpack.c.bf16 %v1538_v35, %v1538_v35  ;;  %v3138_v48 = vadd.f32 %v3137_v28, %v3136_v56  ;;  %v3139_v8 = vpop.f32.mrf.mxu0  ;;  %v3107_v60 = vadd.f32 %v3852_v47, %v3848_v45 }
 0x13a   :  { %1374 = vst [vmem:[#allocation3 + $0x34] sm:$0xf] %v2997_v33  ;;  %v938_v10 = vmax.f32 %v915_v41, 0.0 }
 0x13b   :  { %v1167_v14 = vld [vmem:[#allocation2 + $0x1] sm:$0xff]  ;;  %1157 = vst [vmem:[#allocation3 + $0x48] sm:$0xf] %v2970_v44  ;;  %1574 = vst [vmem:[#allocation3 + $0x20] sm:$0xf] %v3024_v46  ;;  %v854_v17 = vadd.f32 %v3138_v48, %v790_v24  ;;  %v3140_v18 = vpop.f32.mrf.mxu0  ;;  %v803_v36 = vadd.f32 %v3107_v60, %v739_v12 }
 0x13c   :  { %v1212_v15 = vld [vmem:[#allocation2 + $0x2] sm:$0xff]  ;;  %v2975_v42 = vpack.c.bf16 %v1167_v14, %v1167_v14  ;;  %945 = vst [vmem:[#allocation2 + $0x18] sm:$0xff] %v938_v10  ;;  %v3141_v45 = vadd.f32 %v3140_v18, %v3139_v8  ;;  %v1122_v26 = vsel %vm1101_vm12, %v938_v10, 0.0  ;;  %v2998_v31 = vpack.c.bf16 %v938_v10, %v938_v10 }
 0x13d   :  { %v1285_v16 = vld [vmem:[#allocation2 + $0x7] sm:$0xff]  ;;  %v1240_v43 = vsel %vm1219_vm13, %v1212_v15, 0.0  ;;  %v918_v22 = vadd.f32 %v3875_v7, %v854_v17  ;;  %v3142_v23 = vpop.f32.mrf.mxu0  ;;  %v2971_v30 = vpack.c.bf16 %v1122_v26, %v1122_v26  ;;  %v1539_v32 = vsel %vm1220_vm8, %v938_v10, 0.0  ;;  %v925_v17 = vpop.f32.mrf.mxu1 }
 0x13e   :  { %v1292_v52 = vsel %vm1098_vm9, %v1285_v16, 0.0  ;;  %v2982_v47 = vpack.c.bf16 %v1240_v43, %v1240_v43  ;;  %1203 = vst [vmem:[#allocation3 + $0x4] sm:$0xf] %v2975_v42  ;;  %v859_v27 = vadd.f32 %v3141_v45, %v795_v9  ;;  %v3025_v29 = vpack.c.bf16 %v1539_v32, %v1539_v32  ;;  %1375 = vst [vmem:[#allocation3 + $0x58] sm:$0xf] %v2998_v31  ;;  %v3554_v31 = vld [vmem:[#allocation8 + $0x138] sm:$0xff]  }
 0x13f   :  { %v2989_v20 = vpack.c.bf16 %v1292_v52, %v1292_v52  ;;  %v1168_v49 = vld [vmem:[#allocation2 + $0x9] sm:$0xff]  ;;  %v939_v51 = vmax.f32 %v918_v22, 0.0  ;;  %v3143_v7 = vpop.f32.mrf.mxu0  ;;  %1158 = vst [vmem:[#allocation3 + $0x6c] sm:$0xf] %v2971_v30 }
 0x140   :  { %1276 = vst [vmem:[#allocation3 + $0x8] sm:$0xf] %v2982_v47  ;;  %v1213_v13 = vld [vmem:[#allocation2 + $0xa] sm:$0xff]  ;;  %v2976_v53 = vpack.c.bf16 %v1168_v49, %v1168_v49  ;;  %v1389_v56 = vsel %vm1219_vm13, %v1168_v49, 0.0  ;;  %1575 = vst [vmem:[#allocation3 + $0x44] sm:$0xf] %v3025_v29  ;;  %v923_v39 = vadd.f32 %v3913_v38, %v859_v27  ;;  %v3144_v24 = vadd.f32 %v3143_v7, %v3142_v23 }
 0x141   :  { %1328 = vst [vmem:[#allocation3 + $0xc] sm:$0xf] %v2989_v20  ;;  %v1286_v50 = vld [vmem:[#allocation2 + $0xf] sm:$0xff]  ;;  %v1241_v54 = vsel %vm1220_vm8, %v1213_v13, 0.0  ;;  %v3003_v2 = vpack.c.bf16 %v1389_v56, %v1389_v56  ;;  %946 = vst [vmem:[#allocation2 + $0x20] sm:$0xff] %v939_v51  ;;  %v3145_v4 = vpop.f32.mrf.mxu0  ;;  %v1540_v28 = vsel %vm1221_vm15, %v939_v51, 0.0  ;;  %v2999_v48 = vpack.c.bf16 %v939_v51, %v939_v51 }
 0x142   :  { %v1293_v55 = vsel %vm1099_vm11, %v1286_v50, 0.0  ;;  %v1434_v58 = vld [vmem:[#allocation2 + $0xe] sm:$0xff]  ;;  %v2983_v0 = vpack.c.bf16 %v1241_v54, %v1241_v54  ;;  %v3017_v6 = vpack.c.bf16 %v1286_v50, %v1286_v50  ;;  %1204 = vst [vmem:[#allocation3 + $0x28] sm:$0xf] %v2976_v53  ;;  %v3026_v41 = vpack.c.bf16 %v1540_v28, %v1540_v28  ;;  %v3557_v7 = vld [vmem:[#allocation8 + $0x170] sm:$0xff]  }
 0x143   :  { %v2990_v1 = vpack.c.bf16 %v1293_v55, %v1293_v55  ;;  %v1441_v3 = vsel %vm1098_vm9, %v1434_v58, 0.0  ;;  %1425 = vst [vmem:[#allocation3 + $0x14] sm:$0xf] %v3003_v2  ;;  %v1169_v33 = vld [vmem:[#allocation2 + $0x11] sm:$0xff]  ;;  %v3146_v44 = vpop.f32.mrf.mxu0  ;;  %v1123_v46 = vsel %vm1102_vm0, %v939_v51, 0.0  ;;  %v3985_v8 = vmax.f32 %v923_v39, 0.0 }
 0x144   :  { %v3010_v5 = vpack.c.bf16 %v1441_v3, %v1441_v3  ;;  %1277 = vst [vmem:[#allocation3 + $0x2c] sm:$0xf] %v2983_v0  ;;  %v1214_v35 = vld [vmem:[#allocation2 + $0x12] sm:$0xff]  ;;  %1522 = vst [vmem:[#allocation3 + $0x1c] sm:$0xf] %v3017_v6  ;;  %v3147_v9 = vadd.f32 %v3146_v44, %v3145_v4  ;;  %v2977_v40 = vpack.c.bf16 %v1169_v33, %v1169_v33  ;;  %v1390_v22 = vsel %vm1220_vm8, %v1169_v33, 0.0 }
 0x145   :  { %1329 = vst [vmem:[#allocation3 + $0x30] sm:$0xf] %v2990_v1  ;;  %v1287_v19 = vld [vmem:[#allocation2 + $0x17] sm:$0xff]  ;;  %v1242_v38 = vsel %vm1221_vm15, %v1214_v35, 0.0  ;;  %1576 = vst [vmem:[#allocation3 + $0x68] sm:$0xf] %v3026_v41  ;;  %v862_v11 = vadd.f32 %v3144_v24, %v798_v34  ;;  %v3148_v14 = vpop.f32.mrf.mxu0  ;;  %v2972_v15 = vpack.c.bf16 %v1123_v46, %v1123_v46  ;;  %v3004_v32 = vpack.c.bf16 %v1390_v22, %v1390_v22 }
 0x146   :  { %1477 = vst [vmem:[#allocation3 + $0x18] sm:$0xf] %v3010_v5  ;;  %v1435_v10 = vld [vmem:[#allocation2 + $0x16] sm:$0xff]  ;;  %v2984_v12 = vpack.c.bf16 %v1242_v38, %v1242_v38  ;;  %v1294_v60 = vsel %vm1100_vm7, %v1287_v19, 0.0  ;;  %1376 = vst [vmem:[#allocation3 + $0x7c] sm:$0xf] %v2999_v48  ;;  %v867_v18 = vadd.f32 %v3147_v9, %v803_v36  ;;  %v3018_v36 = vpack.c.bf16 %v1287_v19, %v1287_v19 }
 0x147   :  { %947 = vst [vmem:[#allocation2 + $0x28] sm:$0xff] %v3985_v8  ;;  %v1541_v16 = vsel %vm1222_vm3, %v3985_v8, 0.0  ;;  %1205 = vst [vmem:[#allocation3 + $0x4c] sm:$0xf] %v2977_v40  ;;  %v2991_v42 = vpack.c.bf16 %v1294_v60, %v1294_v60  ;;  %v1124_v43 = vsel %vm1103_vm4, %v3985_v8, 0.0  ;;  %v926_v45 = vadd.f32 %v925_v17, %v862_v11  ;;  %v3149_v20 = vpop.f32.mrf.mxu0  ;;  %v3556_v51 = vld [vmem:[#allocation8 + $0x1b8] sm:$0xff]  }
 0x148   :  { %v3027_v52 = vpack.c.bf16 %v1541_v16, %v1541_v16  ;;  %1278 = vst [vmem:[#allocation3 + $0x50] sm:$0xf] %v2984_v12  ;;  %v2973_v47 = vpack.c.bf16 %v1124_v43, %v1124_v43  ;;  %1159 = vst [vmem:[#allocation3 + $0x90] sm:$0xf] %v2972_v15  ;;  %v1170_v23 = vld [vmem:[#allocation2 + $0x19] sm:$0xff]  ;;  %v931_v30 = vadd.f32 %v3892_v25, %v867_v18  ;;  %v1442_v34 = vsel %vm1099_vm11, %v1435_v10, 0.0 }
 0x149   :  { %v1215_v26 = vld [vmem:[#allocation2 + $0x1a] sm:$0xff]  ;;  %1330 = vst [vmem:[#allocation3 + $0x54] sm:$0xf] %v2991_v42  ;;  %v941_v13 = vmax.f32 %v926_v45, 0.0  ;;  %v3547_v50 = vld [vmem:[#allocation3] ss:$36 sps:$4 sm:$0xff]   ;;  %v2978_v29 = vpack.c.bf16 %v1170_v23, %v1170_v23  ;;  %v3011_v54 = vpack.c.bf16 %v1442_v34, %v1442_v34  ;;  %v3000_v0 = vpack.c.bf16 %v3985_v8, %v3985_v8 }
 0x14a   :  { %v1288_v27 = vld [vmem:[#allocation2 + $0x1f] sm:$0xff]  ;;  %1577 = vst [vmem:[#allocation3 + $0x8c] sm:$0xf] %v3027_v52  ;;  %v1243_v53 = vsel %vm1222_vm3, %v1215_v26, 0.0  ;;  %1160 = vst [vmem:[#allocation3 + $0xb4] sm:$0xf] %v2973_v47 }
 0x14b   :  { %v1436_v49 = vld [vmem:[#allocation2 + $0x1e] sm:$0xff]  ;;  %v942_v25 = vmax.f32 %v931_v30, 0.0  ;;  %v3549_v55 = vld [vmem:[#allocation3 + $0x4] ss:$36 sps:$4 sm:$0xff]   ;;  %v2985_v58 = vpack.c.bf16 %v1243_v53, %v1243_v53  ;;  %1426 = vst [vmem:[#allocation3 + $0x38] sm:$0xf] %v3004_v32  ;;  %v3019_v63 = vpack.c.bf16 %v1288_v27, %v1288_v27  ;;  %v3001_v4 = vpack.c.bf16 %v941_v13, %v941_v13 }
 0x14c   :  { %v3550_v56 = vld [vmem:[#allocation3 + $0x8] ss:$36 sps:$4 sm:$0xff]   ;;  %1523 = vst [vmem:[#allocation3 + $0x40] sm:$0xf] %v3018_v36  ;;  %948 = vst [vmem:[#allocation2 + $0x30] sm:$0xff] %v941_v13  ;;  %v1295_v2 = vsel %vm1101_vm12, %v1288_v27, 0.0  ;;  %2403 = vmatprep.mubr.bf16.mxu0 %v3549_v55 }
 0x14d   :  { %v3552_v1 = vld [vmem:[#allocation3 + $0xc] ss:$36 sps:$4 sm:$0xff]   ;;  %1206 = vst [vmem:[#allocation3 + $0x70] sm:$0xf] %v2978_v29  ;;  %1478 = vst [vmem:[#allocation3 + $0x3c] sm:$0xf] %v3011_v54  ;;  %v2992_v28 = vpack.c.bf16 %v1295_v2, %v1295_v2  ;;  %2404 = vmatmul.mubr.bf16.vlgmr.msra.gmra.mxu0 %v3547_v50 }
 0x14e   :  { %v1391_v3 = vsel %vm1221_vm15, %v1170_v23, 0.0  ;;  %949 = vst [vmem:[#allocation2 + $0x38] sm:$0x1] %v942_v25  ;;  %v3558_v5 = vld [vmem:[#allocation8 + $0x130] sm:$0xff]   ;;  %1279 = vst [vmem:[#allocation3 + $0x74] sm:$0xf] %v2985_v58  ;;  %2467 = vmatprep.mubr.bf16.mxu1 %v3552_v1  ;;  %3244 = vmatpush3.bf16.msra.mxu0 %v3554_v31 }
 0x14f   :  { %v3559_v6 = vld [vmem:[#allocation8 + $0x1f0] sm:$0xff]   ;;  %v3005_v39 = vpack.c.bf16 %v1391_v3, %v1391_v3  ;;  %v1443_v33 = vsel %vm1100_vm7, %v1436_v49, 0.0  ;;  %1524 = vst [vmem:[#allocation3 + $0x64] sm:$0xf] %v3019_v63  ;;  %1377 = vst [vmem:[#allocation3 + $0xa0] sm:$0xf] %v3000_v0  ;;  %2468 = vmatmul.mubr.bf16.vlgmr.msra.gmra.mxu1 %v3550_v56  ;;  %3245 = vmatprep.subr.bf16.mxu0 %v3557_v7 }
 0x150   :  { %v1542_v35 = vsel %vm1223_vm5, %v941_v13, 0.0  ;;  %v1171_v19 = vld [vmem:[#allocation2 + $0x21] sm:$0xff]  ;;  %v3012_v44 = vpack.c.bf16 %v1443_v33, %v1443_v33  ;;  %1378 = vst [vmem:[#allocation3 + $0xc4] sm:$0xf] %v3001_v4  ;;  %v3560_v8 = vld [vmem:[#allocation8 + $0x1b0] sm:$0xff]   ;;  %3284 = vmatpush3.bf16.msra.mxu1 %v3556_v51  ;;  %v3566_v10 = vld [vmem:[#allocation8 + $0x168] sm:$0xff]  }
 0x151   :  { %v1216_v41 = vld [vmem:[#allocation2 + $0x22] sm:$0xff]  ;;  %v3028_v46 = vpack.c.bf16 %v1542_v35, %v1542_v35  ;;  %1331 = vst [vmem:[#allocation3 + $0x78] sm:$0xf] %v2992_v28  ;;  %v2979_v21 = vpack.c.bf16 %v1171_v19, %v1171_v19  ;;  %v1392_v38 = vsel %vm1222_vm3, %v1171_v19, 0.0  ;;  %1427 = vst [vmem:[#allocation3 + $0x5c] sm:$0xf] %v3005_v39  ;;  %3285 = vmatprep.subr.bf16.mxu1 %v3559_v6 }
 0x152   :  { %v1289_v24 = vld [vmem:[#allocation2 + $0x27] sm:$0xff]  ;;  %v1244_v9 = vsel %vm1223_vm5, %v1216_v41, 0.0  ;;  %v3006_v60 = vpack.c.bf16 %v1392_v38, %v1392_v38  ;;  %1479 = vst [vmem:[#allocation3 + $0x60] sm:$0xf] %v3012_v44  ;;  %v3568_v15 = vld [vmem:[#allocation8 + $0x128] sm:$0xff]   ;;  %3246 = vmatpush3.bf16.msra.mxu0 %v3558_v5  ;;  %vm1224_vm9 = vcmp.le.s32.totalorder %v3946_v37, 5 }
 0x153   :  { %v1437_v48 = vld [vmem:[#allocation2 + $0x26] sm:$0xff]  ;;  %v1296_v40 = vsel %vm1102_vm0, %v1289_v24, 0.0  ;;  %v2986_v11 = vpack.c.bf16 %v1244_v9, %v1244_v9  ;;  %1578 = vst [vmem:[#allocation3 + $0xb0] sm:$0xf] %v3028_v46  ;;  %v3569_v16 = vld [vmem:[#allocation8 + $0x1e8] sm:$0xff]   ;;  %v3020_v18 = vpack.c.bf16 %v1289_v24, %v1289_v24  ;;  %3247 = vmatprep.subr.bf16.mxu0 %v3566_v10  ;;  %v3589_v37 = vld [vmem:[#allocation8 + $0x1d0] sm:$0xff]  }
 0x154   :  { %v2993_v12 = vpack.c.bf16 %v1296_v40, %v1296_v40  ;;  %v1444_v14 = vsel %vm1101_vm12, %v1437_v48, 0.0  ;;  %1207 = vst [vmem:[#allocation3 + $0x94] sm:$0xf] %v2979_v21  ;;  %v3570_v42 = vld [vmem:[#allocation8 + $0x1a8] sm:$0xff]   ;;  %v3571_v43 = vld [vmem:[#allocation8 + $0x160] sm:$0xff]   ;;  %3286 = vmatpush3.bf16.msra.mxu1 %v3560_v8  ;;  %v3580_v4 = vld [vmem:[#allocation8 + $0x158] sm:$0xff]  }
 0x155   :  { %v3013_v17 = vpack.c.bf16 %v1444_v14, %v1444_v14  ;;  %1280 = vst [vmem:[#allocation3 + $0x98] sm:$0xf] %v2986_v11  ;;  %v1164_v52 = vld [vmem:[#allocation3 + $0xd8] sm:$0x1]  ;;  %1428 = vst [vmem:[#allocation3 + $0x80] sm:$0xf] %v3006_v60  ;;  %3287 = vmatprep.subr.bf16.mxu1 %v3569_v16 }
 0x156   :  { %1332 = vst [vmem:[#allocation3 + $0x9c] sm:$0xf] %v2993_v12  ;;  %v1097_v45 = vld [vmem:[#allocation2 + $0x30] sm:$0x1]  ;;  %v1173_v20 = vld [vmem:[#allocation2 + $0x31] sm:$0x1]  ;;  %3248 = vmatpush3.bf16.msra.mxu0 %v3568_v15 }
 0x157   :  { %v1172_v47 = vld [vmem:[#allocation2 + $0x29] sm:$0xff]  ;;  %v1209_v22 = vld [vmem:[#allocation3 + $0xdc] sm:$0x1]  ;;  %v1282_v23 = vld [vmem:[#allocation3 + $0xe0] sm:$0x1]  ;;  %v1125_v26 = vsel %vm1104_vm2, %v1097_v45, 0.0  ;;  %v2981_v27 = vpack.c.bf16 %v1173_v20, %v1173_v20  ;;  %3249 = vmatprep.subr.bf16.mxu0 %v3571_v43 }
 0x158   :  { %1480 = vst [vmem:[#allocation3 + $0x84] sm:$0xf] %v3013_v17  ;;  %1525 = vst [vmem:[#allocation3 + $0x88] sm:$0xf] %v3020_v18  ;;  %v1217_v30 = vld [vmem:[#allocation2 + $0x2a] sm:$0xff]  ;;  %v2980_v34 = vpack.c.bf16 %v1172_v47, %v1172_v47  ;;  %v1393_v49 = vsel %vm1223_vm5, %v1172_v47, 0.0  ;;  %v2974_v13 = vpack.c.bf16 %v1125_v26, %v1125_v26  ;;  %3288 = vmatpush3.bf16.msra.mxu1 %v3570_v42 }
 0x159   :  { %v1218_v31 = vld [vmem:[#allocation2 + $0x32] sm:$0x1]  ;;  %v1334_v36 = vld [vmem:[#allocation3 + $0xe4] sm:$0x1]  ;;  %v1291_v51 = vld [vmem:[#allocation2 + $0x37] sm:$0x1]  ;;  %v3007_v54 = vpack.c.bf16 %v1393_v49, %v1393_v49  ;;  %v1210_v46 = vsel %vm3809_vm1, %v2981_v27, %v1209_v22  ;;  %3289 = vmatprep.subr.bf16.mxu1 %v3573_v61 }
 0x15a   :  { %v1290_v32 = vld [vmem:[#allocation2 + $0x2f] sm:$0xff]  ;;  %v1246_v50 = vsel %vm1225_vm14, %v1218_v31, 0.0  ;;  %v1343_v29 = vld [vmem:[#allocation2 + $0x38] sm:$0x1]  ;;  %v1298_v56 = vsel %vm1104_vm2, %v1291_v51, 0.0  ;;  %v1245_v3 = vsel %vm1224_vm9, %v1217_v30, 0.0  ;;  %v1165_v35 = vsel %vm3809_vm1, %v2974_v13, %v1164_v52 }
 0x15b   :  { %v1438_v7 = vld [vmem:[#allocation2 + $0x2e] sm:$0xff]  ;;  %v3021_v25 = vpack.c.bf16 %v1290_v32, %v1290_v32  ;;  %v2988_v55 = vpack.c.bf16 %v1246_v50, %v1246_v50  ;;  %v3002_v58 = vpack.c.bf16 %v1343_v29, %v1343_v29  ;;  %v1439_v0 = vld [vmem:[#allocation2 + $0x36] sm:$0xff]  ;;  %1208 = vst [vmem:[#allocation3 + $0xb8] sm:$0xf] %v2980_v34  ;;  %v2995_v6 = vpack.c.bf16 %v1298_v56, %v1298_v56  ;;  %v3584_v19 = vld [vmem:[#allocation8 + $0x1d8] sm:$0xff]  }
 0x15c   :  { %v3572_v53 = vld [vmem:[#allocation8 + $0x120] sm:$0xff]   ;;  %v1387_v63 = vld [vmem:[#allocation2 + $0x31] sm:$0xff]  ;;  %v1379_v5 = vld [vmem:[#allocation3 + $0xe8] sm:$0x1]  ;;  %v2987_v33 = vpack.c.bf16 %v1245_v3, %v1245_v3  ;;  %v1297_v57 = vsel %vm1103_vm4, %v1290_v32, 0.0  ;;  %v1445_v38 = vsel %vm1102_vm0, %v1438_v7, 0.0 }
 0x15d   :  { %v1491_v1 = vld [vmem:[#allocation2 + $0x37] sm:$0xff]  ;;  %v3574_v2 = vld [vmem:[#allocation8 + $0x1a0] sm:$0xff]   ;;  %1429 = vst [vmem:[#allocation3 + $0xa4] sm:$0xf] %v3007_v54  ;;  %1526 = vst [vmem:[#allocation3 + $0xac] sm:$0xf] %v3021_v25  ;;  %v2994_v44 = vpack.c.bf16 %v1297_v57, %v1297_v57  ;;  %v1283_v48 = vsel %vm3809_vm1, %v2988_v55, %v1282_v23  ;;  %v1335_v9 = vsel %vm3809_vm1, %v2995_v6, %v1334_v36  ;;  %3250 = vmatpush3.bf16.msra.mxu0 %v3572_v53 }
 0x15e   :  { %v1536_v28 = vld [vmem:[#allocation2 + $0x38] sm:$0xff]  ;;  %v3563_v41 = vld [vmem:[#allocation3 + $0x48] ss:$36 sps:$4 sm:$0xff]   ;;  %1166 = vst [vmem:[#allocation3 + $0xd8] sm:$0x1] %v1165_v35  ;;  %v1394_v8 = vsel %vm1224_vm9, %v1387_v63, 0.0  ;;  %v3014_v11 = vpack.c.bf16 %v1445_v38, %v1445_v38  ;;  %v3022_v60 = vpack.c.bf16 %v1491_v1, %v1491_v1  ;;  %v1380_v59 = vsel %vm3809_vm1, %v3002_v58, %v1379_v5  ;;  %3290 = vmatpush3.bf16.msra.mxu1 %v3574_v2 }
 0x15f   :  { %v3561_v39 = vld [vmem:[#allocation3 + $0x4c] ss:$36 sps:$4 sm:$0xff]   ;;  %v3564_v24 = vld [vmem:[#allocation3 + $0x54] ss:$36 sps:$4 sm:$0xff]   ;;  %1281 = vst [vmem:[#allocation3 + $0xbc] sm:$0xf] %v2987_v33  ;;  %v3008_v40 = vpack.c.bf16 %v1394_v8, %v1394_v8  ;;  %3251 = vmatprep.subr.bf16.mxu0 %v3580_v4  ;;  %3291 = vmatprep.subr.bf16.mxu1 %v3584_v19 }
 0x160   :  { %2411 = vmatprep.mubr.bf16.mxu0 %v3561_v39  ;;  %v3567_v21 = vld [vmem:[#allocation3 + $0x50] ss:$36 sps:$4 sm:$0xff]   ;;  %1211 = vst [vmem:[#allocation3 + $0xdc] sm:$0x1] %v1210_v46  ;;  %1284 = vst [vmem:[#allocation3 + $0xe0] sm:$0x1] %v1283_v48  ;;  %2475 = vmatprep.mubr.bf16.mxu1 %v3564_v24 }
 0x161   :  { %v1446_v10 = vsel %vm1103_vm4, %v1439_v0, 0.0  ;;  %2412 = vmatmul.mubr.bf16.gmra.mxu0 %v3563_v41  ;;  %1333 = vst [vmem:[#allocation3 + $0xc0] sm:$0xf] %v2994_v44  ;;  %1336 = vst [vmem:[#allocation3 + $0xe4] sm:$0x1] %v1335_v9  ;;  %v1543_v14 = vsel %vm1224_vm9, %v1536_v28, 0.0  ;;  %2476 = vmatmul.mubr.bf16.gmra.mxu1 %v3567_v21 }
 0x162   :  { %v3015_v12 = vpack.c.bf16 %v1446_v10, %v1446_v10  ;;  %v3583_v15 = vld [vmem:[#allocation8 + $0x118] sm:$0xff]   ;;  %1430 = vst [vmem:[#allocation3 + $0xc8] sm:$0xf] %v3008_v40  ;;  %v3029_v17 = vpack.c.bf16 %v1543_v14, %v1543_v14  ;;  %v3587_v18 = vld [vmem:[#allocation8 + $0x150] sm:$0xff]   ;;  %1481 = vst [vmem:[#allocation3 + $0xa8] sm:$0xf] %v3014_v11 }
 0x163   :  { %v3586_v16 = vld [vmem:[#allocation8 + $0x198] sm:$0xff]   ;;  %1527 = vst [vmem:[#allocation3 + $0xd0] sm:$0xf] %v3022_v60  ;;  %1381 = vst [vmem:[#allocation3 + $0xe8] sm:$0x1] %v1380_v59  ;;  %3252 = vmatpush3.bf16.msra.mxu0 %v3583_v15  ;;  %v3590_v45 = vld [vmem:[#allocation8 + $0x190] sm:$0xff]  }
 0x164   :  { %1482 = vst [vmem:[#allocation3 + $0xcc] sm:$0xf] %v3015_v12  ;;  %v3575_v42 = vld [vmem:[#allocation3 + $0x94] ss:$36 sps:$4 sm:$0xff]   ;;  %1579 = vst [vmem:[#allocation3 + $0xd4] sm:$0xf] %v3029_v17  ;;  %3292 = vmatpush3.bf16.msra.mxu1 %v3586_v16  ;;  %3253 = vmatprep.subr.bf16.mxu0 %v3587_v18 }
 0x165   :  { %v3577_v43 = vld [vmem:[#allocation3 + $0x90] ss:$36 sps:$4 sm:$0xff]   ;;  %2419 = vmatprep.mubr.bf16.mxu0 %v3575_v42  ;;  %3293 = vmatprep.subr.bf16.mxu1 %v3589_v37  ;;  %v3592_v23 = vld [vmem:[#allocation8 + $0x148] sm:$0xff]   ;;  %v3603_v32 = vld [vmem:[#allocation8 + $0x140] sm:$0xff]  }
 0x166   :  { %v3582_v61 = vld [vmem:[#allocation3 + $0x98] ss:$36 sps:$4 sm:$0xff]   ;;  %v3598_v26 = vld [vmem:[#allocation8 + $0x1c8] sm:$0xff]   ;;  %v3605_v34 = vld [vmem:[#allocation8 + $0x1c0] sm:$0xff]  }
 0x167   :  { %v1613_v52 = vld [vmem:[#allocation3 + $0xd8] sm:$0x11]  ;;  %3254 = vmatpush3.bf16.msra.mxu0 %v3588_v62  ;;  %v3594_v30 = vld [vmem:[#allocation8 + $0x108] sm:$0xff]   ;;  %v3604_v49 = vld [vmem:[#allocation8 + $0x100] sm:$0xff]  }
 0x168   :  { %v3578_v47 = vld [vmem:[#allocation3 + $0x9c] ss:$36 sps:$4 sm:$0xff]   ;;  %v2888_v20 = vcombine.high %v1613_v52, %v1613_v52  ;;  %3294 = vmatpush3.bf16.msra.mxu1 %v3590_v45  ;;  %v3599_v31 = vld [vmem:[#allocation8 + $0x188] sm:$0xff]   ;;  %3255 = vmatprep.subr.bf16.mxu0 %v3592_v23  ;;  %v2887_v36 = vcombine.low %v1613_v52, %v1613_v52  ;;  %v3597_v13 = vld [vmem:[#allocation3 + $0x14] ss:$36 sps:$4 sm:$0xff]  }
 0x169   :  { %2420 = vmatmul.mubr.bf16.gmra.mxu0 %v3577_v43  ;;  %v1614_v22 = vld [vmem:[#allocation3 + $0xe0] sm:$0x11]  ;;  %2483 = vmatprep.mubr.bf16.mxu1 %v3578_v47  ;;  %v3607_v7 = vld [vmem:[#allocation8 + $0x238] sm:$0xff]   ;;  %v3595_v53 = vld [vmem:[#allocation3 + $0x10] ss:$36 sps:$4 sm:$0xff]  }
 0x16a   :  { %2427 = vmatprep.mubr.bf16.mxu0 %v2888_v20  ;;  %v2890_v27 = vcombine.high %v1614_v22, %v1614_v22  ;;  %2484 = vmatmul.mubr.bf16.gmra.mxu1 %v3582_v61  ;;  %v3606_v50 = vld [vmem:[#allocation8 + $0x180] sm:$0xff]   ;;  %v2889_v51 = vcombine.low %v1614_v22, %v1614_v22  ;;  %v3612_v54 = vld [vmem:[#allocation8 + $0x230] sm:$0xff]   ;;  %v3600_v55 = vld [vmem:[#allocation3 + $0x18] ss:$36 sps:$4 sm:$0xff]  }
 0x16b   :  { %3295 = vmatprep.subr.bf16.mxu1 %v3598_v26  ;;  %3256 = vmatpush3.bf16.msra.mxu0 %v3594_v30  ;;  %v3602_v29 = vld [vmem:[#allocation3 + $0x1c] ss:$36 sps:$4 sm:$0xff]   ;;  %v3610_v56 = vld [vmem:[#allocation3 + $0x64] ss:$36 sps:$4 sm:$0xff]   ;;  %v3617_v5 = vld [vmem:[#allocation3 + $0xac] ss:$36 sps:$4 sm:$0xff]  }
 0x16c   :  { %2491 = vmatprep.mubr.bf16.mxu1 %v2890_v27  ;;  %3296 = vmatpush3.bf16.msra.mxu1 %v3599_v31  ;;  %v3608_v25 = vld [vmem:[#allocation3 + $0x5c] ss:$36 sps:$4 sm:$0xff]   ;;  %v3613_v58 = vld [vmem:[#allocation8 + $0x228] sm:$0xff]   ;;  %v1616_v33 = vld [vmem:[#allocation3 + $0xf0] sm:$0x11] }
 0x16d   :  { %3257 = vmatprep.subr.bf16.mxu0 %v3603_v32  ;;  %3297 = vmatprep.subr.bf16.mxu1 %v3605_v34  ;;  %v1600_v63 = vld [vmem:[#allocation3 + $0x7c] sm:$0xff]  ;;  %v3614_v3 = vld [vmem:[#allocation3 + $0xa4] ss:$36 sps:$4 sm:$0xff]   ;;  %v3623_v19 = vld [vmem:[#allocation8 + $0x210] sm:$0xff]   ;;  %v2894_v24 = vcombine.high %v1616_v33, %v1616_v33  ;;  %v2893_v8 = vcombine.low %v1616_v33, %v1616_v33 }
 0x16e   :  { %v1595_v0 = vld [vmem:[#allocation3 + $0x58] sm:$0xff]  ;;  %v3619_v2 = vld [vmem:[#allocation8 + $0x220] sm:$0xff]   ;;  %v1615_v39 = vld [vmem:[#allocation3 + $0xe8] sm:$0x11] }
 0x16f   :  { %3258 = vmatpush3.bf16.msra.mxu0 %v3604_v49  ;;  %v2873_v1 = vcombine.low %v1595_v0, %v1600_v63  ;;  %v3616_v4 = vld [vmem:[#allocation3 + $0x60] ss:$36 sps:$4 sm:$0xff]   ;;  %v3620_v6 = vld [vmem:[#allocation8 + $0x218] sm:$0xff]   ;;  %v2892_v41 = vcombine.high %v1615_v39, %v1615_v39  ;;  %v3622_v44 = vld [vmem:[#allocation3 + $0xa8] ss:$36 sps:$4 sm:$0xff]   ;;  %v2891_v48 = vcombine.low %v1615_v39, %v1615_v39 }
 0x170   :  { %3298 = vmatpush3.bf16.msra.mxu1 %v3606_v50  ;;  %3359 = vmatprep.subr.bf16.mxu0 %v3607_v7  ;;  %v1610_v28 = vld [vmem:[#allocation3 + $0xc4] sm:$0xff]  ;;  %v3629_v40 = vld [vmem:[#allocation3 + $0xb0] ss:$36 sps:$4 sm:$0xff]   ;;  %v3632_v10 = vld [vmem:[#allocation3 + $0xf8] ss:$0 sps:$4 sm:$0x11]  }
 0x171   :  { %2428 = vmatmul.mubr.bf16.gmra.mxu0 %v2887_v36  ;;  %3383 = vmatprep.subr.bf16.mxu1 %v3607_v7  ;;  %v1605_v57 = vld [vmem:[#allocation3 + $0xa0] sm:$0xff]  ;;  %v3626_v46 = vld [vmem:[#allocation8 + $0x208] sm:$0xff]  }
 0x172   :  { %2531 = vmatprep.mubr.bf16.mxu0 %v3597_v13  ;;  %2492 = vmatmul.mubr.bf16.gmra.mxu1 %v2889_v51  ;;  %v2882_v35 = vcombine.low %v1605_v57, %v1610_v28  ;;  %v3630_v21 = vld [vmem:[#allocation8 + $0x200] sm:$0xff]   ;;  %v3631_v38 = vld [vmem:[#allocation3 + $0x68] ss:$36 sps:$4 sm:$0xff]   ;;  %v2859_v57 = vld [vmem:[%s4100_s4] ss:$0 sm:$0xff] }
 0x173   :  { %2595 = vmatprep.mubr.bf16.mxu1 %v3602_v29  ;;  %v3628_v9 = vld [vmem:[#allocation3 + $0x20] ss:$36 sps:$4 sm:$0xff]  }
 0x179   :  { %2532 = vmatmul.mubr.bf16.vlgmr.msra.gmra.mxu0 %v3595_v53 }
 0x17a   :  { %2539 = vmatprep.mubr.bf16.mxu0 %v3608_v25  ;;  %3360 = vmatpush3.bf16.msra.mxu0 %v3607_v7 }
 0x17b   :  { %2596 = vmatmul.mubr.bf16.vlgmr.msra.gmra.mxu1 %v3600_v55  ;;  %3361 = vmatprep.subr.bf16.mxu0 %v3612_v54 }
 0x17c   :  { %2603 = vmatprep.mubr.bf16.mxu1 %v3610_v56  ;;  %3391 = vmatpush3.bf16.msra.mxu1 %v3607_v7 }
 0x17d   :  { %3384 = vmatprep.subr.bf16.mxu1 %v3612_v54 }
 0x17e   :  { %3362 = vmatpush3.bf16.msra.mxu0 %v3612_v54 }
 0x17f   :  { %3363 = vmatprep.subr.bf16.mxu0 %v3613_v58 }
 0x180   :  { %3392 = vmatpush3.bf16.msra.mxu1 %v3612_v54 }
 0x181   :  { %2540 = vmatmul.mubr.bf16.gmra.mxu0 %v2873_v1  ;;  %3385 = vmatprep.subr.bf16.mxu1 %v3613_v58 }
 0x182   :  { %2547 = vmatprep.mubr.bf16.mxu0 %v3614_v3  ;;  %3364 = vmatpush3.bf16.msra.mxu0 %v3613_v58 }
 0x183   :  { %2604 = vmatmul.mubr.bf16.gmra.mxu1 %v3616_v4  ;;  %3365 = vmatprep.subr.bf16.mxu0 %v3619_v2 }
 0x184   :  { %2611 = vmatprep.mubr.bf16.mxu1 %v3617_v5  ;;  %3393 = vmatpush3.bf16.msra.mxu1 %v3613_v58 }
 0x185   :  { %3386 = vmatprep.subr.bf16.mxu1 %v3619_v2 }
 0x186   :  { %3366 = vmatpush3.bf16.msra.mxu0 %v3619_v2 }
 0x187   :  { %3367 = vmatprep.subr.bf16.mxu0 %v3620_v6 }
 0x188   :  { %3394 = vmatpush3.bf16.msra.mxu1 %v3619_v2 }
 0x189   :  { %2548 = vmatmul.mubr.bf16.gmra.mxu0 %v2882_v35  ;;  %3387 = vmatprep.subr.bf16.mxu1 %v3620_v6 }
 0x18a   :  { %2555 = vmatprep.mubr.bf16.mxu0 %v2892_v41  ;;  %3368 = vmatpush3.bf16.msra.mxu0 %v3620_v6 }
 0x18b   :  { %2612 = vmatmul.mubr.bf16.gmra.mxu1 %v3622_v44  ;;  %3369 = vmatprep.subr.bf16.mxu0 %v3623_v19 }
 0x18c   :  { %3395 = vmatpush3.bf16.msra.mxu1 %v3620_v6  ;;  %2619 = vmatprep.mubr.bf16.mxu1 %v2894_v24 }
 0x18d   :  { %3388 = vmatprep.subr.bf16.mxu1 %v3623_v19 }
 0x18e   :  { %3370 = vmatpush3.bf16.msra.mxu0 %v3623_v19 }
 0x18f   :  { %3371 = vmatprep.subr.bf16.mxu0 %v3626_v46 }
 0x190   :  { %3396 = vmatpush3.bf16.msra.mxu1 %v3623_v19 }
 0x191   :  { %2556 = vmatmul.mubr.bf16.gmra.mxu0 %v2891_v48  ;;  %3389 = vmatprep.subr.bf16.mxu1 %v3626_v46 }
 0x192   :  { %3372 = vmatpush3.bf16.msra.mxu0 %v3626_v46  ;;  %3375 = vmatprep.mubr.bf16.mxu0 %v3628_v9 }
 0x193   :  { %2620 = vmatmul.mubr.bf16.gmra.mxu1 %v2893_v8  ;;  %3373 = vmatprep.subr.bf16.mxu0 %v3630_v21 }
 0x194   :  { %3397 = vmatpush3.bf16.msra.mxu1 %v3626_v46  ;;  %3379 = vmatprep.mubr.bf16.mxu1 %v3629_v40 }
 0x195   :  { %3390 = vmatprep.subr.bf16.mxu1 %v3630_v21 }
 0x196   :  { %3374 = vmatpush3.bf16.msra.mxu0 %v3630_v21 }
 0x198   :  { %3398 = vmatpush3.bf16.msra.mxu1 %v3630_v21 }
 0x199   :  { %3376 = vmatmul.mubr.bf16.vlgmr.msra.gmra.mxu0 %v3631_v38 }
 0x19b   :  { %3380 = vmatmul.mubr.bf16.vlgmr.msra.gmra.mxu1 %v3632_v10 }
 0x20d   :  { %v3179_v11 = vpop.f32.mrf.mxu0 }
 0x20f   :  { %v3219_v12 = vpop.f32.mrf.mxu1  ;;  %v3180_v60 = vpop.f32.mrf.mxu0 }
 0x210   :  { %v3181_v28 = vadd.f32 %v3180_v60, %v3179_v11 }
 0x211   :  { %v3220_v14 = vpop.f32.mrf.mxu1  ;;  %v3182_v15 = vpop.f32.mrf.mxu0 }
 0x212   :  { %v2406_v8 = vadd.f32 %v3181_v28, %v2859_v57  ;;  %v3221_v21 = vadd.f32 %v3220_v14, %v3219_v12 }
 0x213   :  { %v3222_v16 = vpop.f32.mrf.mxu1  ;;  %v3183_v59 = vpop.f32.mrf.mxu0 }
 0x214   :  { %v3184_v35 = vadd.f32 %v3183_v59, %v3182_v15  ;;  %v2470_v12 = vadd.f32 %v3221_v21, %v2406_v8 }
 0x215   :  { %v3223_v17 = vpop.f32.mrf.mxu1 }
 0x216   :  { %v2409_v38 = vadd.f32 %v3184_v35, %v2859_v57  ;;  %v3224_v10 = vadd.f32 %v3223_v17, %v3222_v16 }
 0x221   :  { %v3185_v18 = vpop.f32.mrf.mxu0  ;;  %v3225_v42 = vpop.f32.mrf.mxu1 }
 0x223   :  { %v3186_v37 = vpop.f32.mrf.mxu0  ;;  %v3226_v43 = vpop.f32.mrf.mxu1 }
 0x224   :  { %v3187_v19 = vadd.f32 %v3186_v37, %v3185_v18  ;;  %v3227_v60 = vadd.f32 %v3226_v43, %v3225_v42 }
 0x225   :  { %v3188_v52 = vpop.f32.mrf.mxu0  ;;  %v3228_v62 = vpop.f32.mrf.mxu1 }
 0x226   :  { %v2414_v11 = vadd.f32 %v3187_v19, %v2859_v57 }
 0x227   :  { %v3189_v45 = vpop.f32.mrf.mxu0  ;;  %v3229_v47 = vpop.f32.mrf.mxu1 }
 0x228   :  { %v3190_v41 = vadd.f32 %v3189_v45, %v3188_v52  ;;  %v2478_v14 = vadd.f32 %v3227_v60, %v2414_v11 }
 0x229   :  { %v3191_v20 = vpop.f32.mrf.mxu0 }
 0x22a   :  { %v3231_v61 = vpop.f32.mrf.mxu1 }
 0x22b   :  { %v3192_v22 = vpop.f32.mrf.mxu0 }
 0x22c   :  { %v3232_v23 = vpop.f32.mrf.mxu1  ;;  %v3193_v24 = vadd.f32 %v3192_v22, %v3191_v20 }
 0x22d   :  { %v3194_v26 = vpop.f32.mrf.mxu0 }
 0x22e   :  { %v4054_v27 = vpop.f32.mrf.mxu1 }
 0x22f   :  { %v3195_v30 = vpop.f32.mrf.mxu0 }
 0x230   :  { %v4056_v31 = vpop.f32.mrf.mxu1  ;;  %v3196_v52 = vadd.f32 %v3195_v30, %v3194_v26 }
 0x231   :  { %v3197_v32 = vpop.f32.mrf.mxu0  ;;  %v3236_v26 = vadd.f32 %v4056_v31, %v4054_v27 }
 0x232   :  { %v3237_v34 = vpop.f32.mrf.mxu1  ;;  %v2425_v35 = vadd.f32 %v3196_v52, %v2859_v57 }
 0x233   :  { %v3198_v36 = vpop.f32.mrf.mxu0 }
 0x234   :  { %v3238_v49 = vpop.f32.mrf.mxu1  ;;  %v3199_v48 = vadd.f32 %v3198_v36, %v3197_v32  ;;  %v2473_v36 = vadd.f32 %v3224_v10, %v2409_v38 }
 0x235   :  { %v3200_v13 = vpop.f32.mrf.mxu0  ;;  %v3239_v18 = vadd.f32 %v3238_v49, %v3237_v34 }
 0x236   :  { %v3240_v50 = vpop.f32.mrf.mxu1  ;;  %v2417_v13 = vadd.f32 %v3190_v41, %v2859_v57  ;;  %v2430_v59 = vadd.f32 %v3199_v48, %v2859_v57 }
 0x237   :  { %v3201_v51 = vpop.f32.mrf.mxu0  ;;  %v3230_v50 = vadd.f32 %v3229_v47, %v3228_v62 }
 0x238   :  { %v3241_v7 = vpop.f32.mrf.mxu1  ;;  %v2422_v51 = vadd.f32 %v3193_v24, %v2859_v57  ;;  %v2494_v47 = vadd.f32 %v3239_v18, %v2430_v59 }
 0x239   :  { %v3259_v29 = vpop.f32.mrf.mxu0  ;;  %v3233_v7 = vadd.f32 %v3232_v23, %v3231_v61  ;;  %v2481_v16 = vadd.f32 %v3230_v50, %v2417_v13 }
 0x23b   :  { %v4058_v53 = vpop.f32.mrf.mxu1  ;;  %v3260_v54 = vpop.f32.mrf.mxu0  ;;  %v2486_v17 = vadd.f32 %v3233_v7, %v2422_v51 }
 0x23c   :  { %v3261_v45 = vadd.f32 %v3260_v54, %v3259_v29 }
 0x23d   :  { %v4060_v25 = vpop.f32.mrf.mxu1  ;;  %v3262_v55 = vpop.f32.mrf.mxu0 }
 0x23e   :  { %v2534_v30 = vadd.f32 %v3261_v45, %v2470_v12  ;;  %v3301_v54 = vadd.f32 %v4060_v25, %v4058_v53 }
 0x23f   :  { %v4062_v56 = vpop.f32.mrf.mxu1  ;;  %v3263_v58 = vpop.f32.mrf.mxu0 }
 0x240   :  { %v3264_v34 = vadd.f32 %v3263_v58, %v3262_v55  ;;  %v2598_v53 = vadd.f32 %v3301_v54, %v2534_v30 }
 0x241   :  { %v4064_v63 = vpop.f32.mrf.mxu1  ;;  %v3265_v0 = vpop.f32.mrf.mxu0 }
 0x242   :  { %4110 = vst [vmem:[#allocation11_spill] sm:$0xff] %v4064_v63  ;;  %v2537_v27 = vadd.f32 %v3264_v34, %v2473_v36 }
 0x243   :  { %v3305_v1 = vpop.f32.mrf.mxu1  ;;  %v3266_v2 = vpop.f32.mrf.mxu0 }
 0x244   :  { %v3267_v37 = vadd.f32 %v3266_v2, %v3265_v0 }
 0x245   :  { %v3306_v3 = vpop.f32.mrf.mxu1  ;;  %v3268_v4 = vpop.f32.mrf.mxu0 }
 0x246   :  { %v2542_v61 = vadd.f32 %v3267_v37, %v2478_v14  ;;  %v3307_v23 = vadd.f32 %v3306_v3, %v3305_v1 }
 0x247   :  { %v3308_v5 = vpop.f32.mrf.mxu1  ;;  %v3269_v6 = vpop.f32.mrf.mxu0 }
 0x248   :  { %v3270_v32 = vadd.f32 %v3269_v6, %v3268_v4  ;;  %v2606_v57 = vadd.f32 %v3307_v23, %v2542_v61 }
 0x249   :  { %v3309_v39 = vpop.f32.mrf.mxu1  ;;  %v3271_v33 = vpop.f32.mrf.mxu0  ;;  %v4111_v31 = vld [vmem:[#allocation11_spill] sm:$0xff] }
 0x24a   :  { %v2545_v0 = vadd.f32 %v3270_v32, %v2481_v16  ;;  %v3310_v6 = vadd.f32 %v3309_v39, %v3308_v5  ;;  %v3304_v55 = vadd.f32 %v4111_v31, %v4062_v56 }
 0x24b   :  { %v3311_v44 = vpop.f32.mrf.mxu1  ;;  %v3272_v46 = vpop.f32.mrf.mxu0 }
 0x24c   :  { %v3273_v42 = vadd.f32 %v3272_v46, %v3271_v33  ;;  %v2489_v46 = vadd.f32 %v3236_v26, %v2425_v35  ;;  %v2609_v39 = vadd.f32 %v3310_v6, %v2545_v0  ;;  %v2601_v13 = vadd.f32 %v3304_v55, %v2537_v27 }
 0x24d   :  { %v3312_v9 = vpop.f32.mrf.mxu1  ;;  %v3274_v40 = vpop.f32.mrf.mxu0 }
 0x24e   :  { %v2550_v33 = vadd.f32 %v3273_v42, %v2486_v17  ;;  %v3313_v19 = vadd.f32 %v3312_v9, %v3311_v44 }
 0x24f   :  { %v3314_v63 = vpop.f32.mrf.mxu1  ;;  %v3275_v15 = vpop.f32.mrf.mxu0 }
 0x250   :  { %v3276_v41 = vadd.f32 %v3275_v15, %v3274_v40  ;;  %v2614_v5 = vadd.f32 %v3313_v19, %v2550_v33 }
 0x251   :  { %v3315_v20 = vpop.f32.mrf.mxu1  ;;  %v3277_v22 = vpop.f32.mrf.mxu0 }
 0x252   :  { %v2553_v25 = vadd.f32 %v3276_v41, %v2489_v46  ;;  %v3316_v44 = vadd.f32 %v3315_v20, %v3314_v63 }
 0x253   :  { %v3317_v43 = vpop.f32.mrf.mxu1  ;;  %v3278_v62 = vpop.f32.mrf.mxu0 }
 0x254   :  { %v3279_v28 = vadd.f32 %v3278_v62, %v3277_v22  ;;  %v2617_v52 = vadd.f32 %v3316_v44, %v2553_v25 }
 0x255   :  { %v3318_v49 = vpop.f32.mrf.mxu1  ;;  %v3280_v29 = vpop.f32.mrf.mxu0 }
 0x256   :  { %v2558_v2 = vadd.f32 %v3279_v28, %v2494_v47  ;;  %v3319_v4 = vadd.f32 %v3318_v49, %v3317_v43 }
 0x257   :  { %v3320_v1 = vpop.f32.mrf.mxu1  ;;  %v3281_v3 = vpop.f32.mrf.mxu0 }
 0x258   :  { %v2622_v24 = vadd.f32 %v3319_v4, %v2558_v2 }
 0x259   :  { %v3321_v58 = vpop.f32.mrf.mxu1  ;;  %v3377_v48 = vpop.f32.mrf.mxu0 }
 0x25a   :  { %v2670_v8 = vadd.f32 %v3377_v48, %v2606_v57 }
 0x25b   :  { %v3381_v21 = vpop.f32.mrf.mxu1  ;;  %v2661_v38 = vpop.f32.mrf.mxu0 }
 0x25c   :  { %v2693_v9 = vmax.f32 %v2670_v8, 0.0  ;;  %v2686_v40 = vadd.f32 %v3381_v21, %v2622_v24  ;;  %v2662_v10 = vadd.f32 %v2661_v38, %v2598_v53 }
 0x25d   :  { %v2677_v11 = vpop.f32.mrf.mxu1  ;;  %v3378_v60 = vpop.f32.mrf.mxu0 }
 0x25e   :  { %2700 = vst [vmem:[%s4101_s5 + $0x10] sm:$0xff] %v2693_v9  ;;  %v2697_v56 = vmax.f32 %v2686_v40, 0.0  ;;  %v2691_v50 = vmax.f32 %v2662_v10, 0.0  ;;  %v2678_v51 = vadd.f32 %v2677_v11, %v2614_v5  ;;  %v2673_v7 = vadd.f32 %v3378_v60, %v2609_v39 }
 0x25f   :  { %v3382_v15 = vpop.f32.mrf.mxu1  ;;  %v2664_v59 = vpop.f32.mrf.mxu0 }
 0x260   :  { %2704 = vst [vmem:[%s4101_s5 + $0x30] sm:$0x1] %v2697_v56  ;;  %2698 = vst [vmem:[%s4101_s5] sm:$0xff] %v2691_v50  ;;  %v2695_v63 = vmax.f32 %v2678_v51, 0.0  ;;  %v2694_v18 = vmax.f32 %v2673_v7, 0.0  ;;  %v2665_v37 = vadd.f32 %v2664_v59, %v2601_v13 }
 0x261   :  { %v2680_v45 = vpop.f32.mrf.mxu1 }
 0x262   :  { %2702 = vst [vmem:[%s4101_s5 + $0x20] sm:$0xff] %v2695_v63  ;;  %2701 = vst [vmem:[%s4101_s5 + $0x18] sm:$0xff] %v2694_v18  ;;  %v2692_v20 = vmax.f32 %v2665_v37, 0.0  ;;  %v2681_v22 = vadd.f32 %v2680_v45, %v2617_v52 }
 0x264   :  { %2699 = vst [vmem:[%s4101_s5 + $0x8] sm:$0xff] %v2692_v20  ;;  %v2696_v12 = vmax.f32 %v2681_v22, 0.0 }
 0x266   :  { %2703 = vst [vmem:[%s4101_s5 + $0x28] sm:$0xff] %v2696_v12 }
 0x267   :  { %2709 = vsyncpa [#allocation5], 1 }
 0x268   :  { %2710 = vsyncpa [#allocation7], 1 }

</bundles_post_ra>
